<compile_context>
chip_gen: v7x
topology: tpu7x:2x2x1
jax: 0.10.0
libtpu: 0.0.40
codegen_flags: <defaults>
</compile_context>

<pallas_src>
import functools

import jax
import jax.numpy as jnp
from jax.experimental import pallas as pl
from jax.experimental.pallas import tpu as pltpu

LANE = 128


def _round_up(x, m):
    return ((x + m - 1) // m) * m


def _mlp_kernel(n_in, n_out, n_layers, x_ref, *refs):
    """Fused MLP body.

    refs = (w1, b1, w2, b2, ..., wL, bL, out_ref)
      x_ref : (tb, n_in)        f32   narrow, unpadded input tile
      w1    : (n_in, H1)        f32   first layer -> VPU broadcast-FMAs
      wi    : (H_{i-1}, H_i)    bf16  MXU layers, lane-padded to 128
      bi    : (1, H_i)          f32
      out   : (tb, n_out)       f32   narrow, unpadded output tile

    Padded lanes stay exactly zero because padded weight/bias entries are
    zero and ReLU(0) == 0.  (If the activation is ever changed to one with
    f(0) != 0, this invariant breaks — revisit the padding.)
    """
    out_ref = refs[-1]
    params = refs[:-1]

    # ---- layer 1 on the VPU: K = n_in is tiny, so a 128-deep MXU
    # contraction would be ~97% zero work.  Unrolled broadcast-FMAs build the
    # 128-lane activation directly from the narrow input.
    x = x_ref[...]                               # (tb, n_in) f32
    w1 = params[0][...]                          # (n_in, H1) f32
    b1 = params[1][...]                          # (1, H1)    f32
    h = b1 + x[:, 0:1] * w1[0:1, :]              # (tb, H1)   f32
    for k in range(1, n_in):
        h = h + x[:, k:k + 1] * w1[k:k + 1, :]
    h = jnp.maximum(h, 0.0)

    # ---- layers 2..L on the MXU: bf16 inputs, f32 accumulation.  Bias add
    # and ReLU stay f32 on the VPU (safe on v5e; fine on v6e/v7x).
    for i in range(1, n_layers):
        w = params[2 * i][...]                   # (H_{i-1}, H_i) bf16
        b = params[2 * i + 1][...]               # (1, H_i)       f32
        h = jnp.dot(h.astype(jnp.bfloat16), w,
                    preferred_element_type=jnp.float32) + b
        if i < n_layers - 1:                     # output layer: no activation
            h = jnp.maximum(h, 0.0)

    # Write back only the real output columns (narrow masked store; avoids
    # 64x of zero-padding writeback on a mem/overhead-bound kernel).
    out_ref[...] = h[:, :n_out].astype(out_ref.dtype)


def prepare_fnn_params(weights, biases, lane=LANE):
    """Pad / cast parameters ONCE (hoisted out of the per-call path).

    weights[i]: (in_i, out_i) f32, biases[i]: (out_i,) f32.
    Returns (flat param tuple, real dims, padded dims).
    """
    n_layers = len(weights)
    assert len(biases) == n_layers
    dims = [int(weights[0].shape[0])] + [int(w.shape[1]) for w in weights]
    pdims = [dims[0]] + [_round_up(d, lane) for d in dims[1:]]

    params = []
    for i, (w, b) in enumerate(zip(weights, biases)):
        in_p, out_p = pdims[i], pdims[i + 1]
        wdt = jnp.float32 if i == 0 else jnp.bfloat16   # layer 1 stays f32 (VPU)
        wp = jnp.zeros((in_p, out_p), wdt)
        wp = wp.at[:w.shape[0], :w.shape[1]].set(w.astype(wdt))
        bp = jnp.zeros((1, out_p), jnp.float32)
        bp = bp.at[0, :b.shape[0]].set(b.astype(jnp.float32))
        params.extend([wp, bp])
    return tuple(params), tuple(dims), tuple(pdims)


def fnn_forward(features, params, dims, pdims, *, batch_tile=None):
    """Fused FNN forward.  `params`/`dims`/`pdims` from prepare_fnn_params."""
    B, n_in = features.shape
    n_out = dims[-1]
    n_layers = len(dims) - 1
    assert n_in == dims[0]

    # Batch tiling: single grid step when the batch fits (v5e/v6e have one
    # TensorCore; the grid is a serial loop).  On v7x pass batch_tile so the
    # "parallel" grid has >= 2 steps and both TensorCores engage.  VMEM use is
    # tiny here (~tb*0.75 KiB + ~50 KiB weights), far under scoped defaults.
    if batch_tile is None:
        batch_tile = 2048
    tb = _round_up(min(batch_tile, B), 8)
    Bp = _round_up(B, tb)

    x = features.astype(jnp.float32)
    if Bp != B:
        x = jnp.zeros((Bp, n_in), jnp.float32).at[:B].set(x)

    # Narrow input / output tiles; weights & biases loaded whole with constant
    # index maps so they stay VMEM-resident across grid steps.
    in_specs = [pl.BlockSpec((tb, n_in), lambda i: (i, 0))]
    for li in range(n_layers):
        in_specs.append(
            pl.BlockSpec((pdims[li], pdims[li + 1]), lambda i: (0, 0)))
        in_specs.append(
            pl.BlockSpec((1, pdims[li + 1]), lambda i: (0, 0)))
    out_spec = pl.BlockSpec((tb, n_out), lambda i: (i, 0))

    flops = 2 * Bp * sum(pdims[i] * pdims[i + 1] for i in range(n_layers))
    bytes_accessed = (Bp * n_in * 4 + Bp * n_out * 4
                      + sum(int(p.size) * p.dtype.itemsize for p in params))
    cost = pl.CostEstimate(flops=flops, transcendentals=0,
                           bytes_accessed=bytes_accessed)

    kernel = functools.partial(_mlp_kernel, n_in, n_out, n_layers)
    out = pl.pallas_call(
        kernel,
        out_shape=jax.ShapeDtypeStruct((Bp, n_out), jnp.float32),
        grid_spec=pltpu.PrefetchScalarGridSpec(
            num_scalar_prefetch=0,
            grid=(Bp // tb,),
            in_specs=in_specs,
            out_specs=out_spec,
        ),
        compiler_params=pltpu.CompilerParams(
            dimension_semantics=("parallel",)),
        cost_estimate=cost,
    )(x, *params)

    # Slice off batch padding outside the kernel (cheap XLA op).
    return out[:B].astype(features.dtype)


def fnn_reference(features, weights, biases, *, match_kernel_precision=False):
    """Pure-JAX reference mirroring the PyTorch forward.  With
    match_kernel_precision=True it mimics the kernel's numerics (f32 first
    layer, bf16-input / f32-accumulate matmuls afterwards)."""
    h = features.astype(jnp.float32)
    for i, (w, b) in enumerate(zip(weights, biases)):
        if match_kernel_precision and i > 0:
            h = jnp.dot(h.astype(jnp.bfloat16), w.astype(jnp.bfloat16),
                        preferred_element_type=jnp.float32) + b
        else:
            h = jnp.dot(h, w, preferred_element_type=jnp.float32) + b
        if i < len(weights) - 1:
            h = jnp.maximum(h, 0.0)
    return h


def init_params(key, n_inputs, n_outputs, num_neurons):
    """Deterministic parameter init (uniform, kaiming-ish scale like torch)."""
    dims = [n_inputs] + list(num_neurons) + [n_outputs]
    weights, biases = [], []
    for i in range(len(dims) - 1):
        fan_in, fan_out = dims[i], dims[i + 1]
        key, kw, kb = jax.random.split(key, 3)
        bound = 1.0 / jnp.sqrt(jnp.float32(fan_in))
        weights.append(jax.random.uniform(
            kw, (fan_in, fan_out), jnp.float32, -bound, bound))
        biases.append(jax.random.uniform(
            kb, (fan_out,), jnp.float32, -bound, bound))
    return weights, biases


if __name__ == "__main__":
    # Module config: FNN(n_inputs=4, n_outputs=2, num_hidden_layers=3,
    #                    num_neurons=[32, 32, 32]).
    n_inputs, n_outputs = 4, 2
    num_neurons = [32, 32, 32]
    batch = 256

    key = jax.random.PRNGKey(0)
    key, kx = jax.random.split(key)
    features = jax.random.normal(kx, (batch, n_inputs), jnp.float32)
    weights, biases = init_params(key, n_inputs, n_outputs, num_neurons)

    # Pad / cast parameters once; jit a forward closed over the prepared
    # params so no per-call padding XLA ops are dispatched.
    params, dims, pdims = prepare_fnn_params(weights, biases)
    forward = jax.jit(functools.partial(
        fnn_forward, params=params, dims=dims, pdims=pdims))

    out = jax.block_until_ready(forward(features))

    ref_match = fnn_reference(features, weights, biases,
                              match_kernel_precision=True)
    ref_f32 = fnn_reference(features, weights, biases)

    assert out.shape == (batch, n_outputs)
    assert jnp.allclose(out, ref_match, atol=5e-3, rtol=5e-3), \
        "mismatch vs precision-matched reference"
    assert jnp.allclose(out, ref_f32, atol=5e-2, rtol=5e-2), \
        "mismatch vs f32 reference"

    # 2-step "parallel" grid (v7x: one batch tile per TensorCore).
    forward2 = jax.jit(functools.partial(
        fnn_forward, params=params, dims=dims, pdims=pdims, batch_tile=128))
    out2 = jax.block_until_ready(forward2(features))
    assert jnp.allclose(out2, out, atol=1e-5, rtol=1e-5)

    # Non-multiple-of-8 batch exercises the batch-padding path.
    out3 = jax.block_until_ready(forward(features[:100]))
    assert out3.shape == (100, n_outputs)
    assert jnp.allclose(out3, ref_f32[:100], atol=5e-2, rtol=5e-2)

    print("KERNEL_OK")
</pallas_src>

<mosaic_0001>
module attributes {stable_mosaic.version = 11 : i64} {
  func.func @_mlp_kernel(%arg0: i32, %arg1: memref<256x4xf32, #tpu.memory_space<vmem>>, %arg2: memref<4x128xf32, #tpu.memory_space<vmem>>, %arg3: memref<1x128xf32, #tpu.memory_space<vmem>>, %arg4: memref<128x128xbf16, #tpu.memory_space<vmem>>, %arg5: memref<1x128xf32, #tpu.memory_space<vmem>>, %arg6: memref<128x128xbf16, #tpu.memory_space<vmem>>, %arg7: memref<1x128xf32, #tpu.memory_space<vmem>>, %arg8: memref<128x128xbf16, #tpu.memory_space<vmem>>, %arg9: memref<1x128xf32, #tpu.memory_space<vmem>>, %arg10: memref<256x2xf32, #tpu.memory_space<vmem>>) attributes {dimension_semantics = [#tpu.dimension_semantics<parallel>], iteration_bounds = array<i64: 1>, scalar_prefetch = 0 : i64, scratch_operands = 0 : i64, tpu.core_type = #tpu.core_type<tc>, window_params = [{transform_indices = @transform_0, window_bounds = array<i64: 256, 4>}, {pipeline_mode = #tpu.pipeline_mode<synchronous>, transform_indices = @transform_1, window_bounds = array<i64: 4, 128>}, {pipeline_mode = #tpu.pipeline_mode<synchronous>, transform_indices = @transform_2, window_bounds = array<i64: 1, 128>}, {pipeline_mode = #tpu.pipeline_mode<synchronous>, transform_indices = @transform_3, window_bounds = array<i64: 128, 128>}, {pipeline_mode = #tpu.pipeline_mode<synchronous>, transform_indices = @transform_4, window_bounds = array<i64: 1, 128>}, {pipeline_mode = #tpu.pipeline_mode<synchronous>, transform_indices = @transform_5, window_bounds = array<i64: 128, 128>}, {pipeline_mode = #tpu.pipeline_mode<synchronous>, transform_indices = @transform_6, window_bounds = array<i64: 1, 128>}, {pipeline_mode = #tpu.pipeline_mode<synchronous>, transform_indices = @transform_7, window_bounds = array<i64: 128, 128>}, {pipeline_mode = #tpu.pipeline_mode<synchronous>, transform_indices = @transform_8, window_bounds = array<i64: 1, 128>}, {transform_indices = @transform_9, window_bounds = array<i64: 256, 2>}]} {
    %c0 = arith.constant 0 : index
    %c0_0 = arith.constant 0 : index
    %0 = vector.load %arg1[%c0, %c0_0] : memref<256x4xf32, #tpu.memory_space<vmem>>, vector<256x4xf32>
    %c0_1 = arith.constant 0 : index
    %c0_2 = arith.constant 0 : index
    %1 = vector.load %arg2[%c0_1, %c0_2] : memref<4x128xf32, #tpu.memory_space<vmem>>, vector<4x128xf32>
    %c0_3 = arith.constant 0 : index
    %c0_4 = arith.constant 0 : index
    %2 = vector.load %arg3[%c0_3, %c0_4] : memref<1x128xf32, #tpu.memory_space<vmem>>, vector<1x128xf32>
    %3 = vector.extract_strided_slice %0 {offsets = [0, 0], sizes = [256, 1], strides = [1, 1]} : vector<256x4xf32> to vector<256x1xf32>
    %4 = vector.extract_strided_slice %1 {offsets = [0, 0], sizes = [1, 128], strides = [1, 1]} : vector<4x128xf32> to vector<1x128xf32>
    %5 = vector.broadcast %3 : vector<256x1xf32> to vector<256x128xf32>
    %6 = vector.broadcast %4 : vector<1x128xf32> to vector<256x128xf32>
    %7 = arith.mulf %5, %6 : vector<256x128xf32>
    %8 = vector.broadcast %2 : vector<1x128xf32> to vector<256x128xf32>
    %9 = arith.addf %8, %7 : vector<256x128xf32>
    %10 = vector.extract_strided_slice %0 {offsets = [0, 1], sizes = [256, 1], strides = [1, 1]} : vector<256x4xf32> to vector<256x1xf32>
    %11 = vector.extract_strided_slice %1 {offsets = [1, 0], sizes = [1, 128], strides = [1, 1]} : vector<4x128xf32> to vector<1x128xf32>
    %12 = vector.broadcast %10 : vector<256x1xf32> to vector<256x128xf32>
    %13 = vector.broadcast %11 : vector<1x128xf32> to vector<256x128xf32>
    %14 = arith.mulf %12, %13 : vector<256x128xf32>
    %15 = arith.addf %9, %14 : vector<256x128xf32>
    %16 = vector.extract_strided_slice %0 {offsets = [0, 2], sizes = [256, 1], strides = [1, 1]} : vector<256x4xf32> to vector<256x1xf32>
    %17 = vector.extract_strided_slice %1 {offsets = [2, 0], sizes = [1, 128], strides = [1, 1]} : vector<4x128xf32> to vector<1x128xf32>
    %18 = vector.broadcast %16 : vector<256x1xf32> to vector<256x128xf32>
    %19 = vector.broadcast %17 : vector<1x128xf32> to vector<256x128xf32>
    %20 = arith.mulf %18, %19 : vector<256x128xf32>
    %21 = arith.addf %15, %20 : vector<256x128xf32>
    %22 = vector.extract_strided_slice %0 {offsets = [0, 3], sizes = [256, 1], strides = [1, 1]} : vector<256x4xf32> to vector<256x1xf32>
    %23 = vector.extract_strided_slice %1 {offsets = [3, 0], sizes = [1, 128], strides = [1, 1]} : vector<4x128xf32> to vector<1x128xf32>
    %24 = vector.broadcast %22 : vector<256x1xf32> to vector<256x128xf32>
    %25 = vector.broadcast %23 : vector<1x128xf32> to vector<256x128xf32>
    %26 = arith.mulf %24, %25 : vector<256x128xf32>
    %27 = arith.addf %21, %26 : vector<256x128xf32>
    %cst = arith.constant 0.000000e+00 : f32
    %28 = vector.broadcast %cst : f32 to vector<256x128xf32>
    %29 = arith.maximumf %27, %28 : vector<256x128xf32>
    %c0_5 = arith.constant 0 : index
    %c0_6 = arith.constant 0 : index
    %30 = vector.load %arg4[%c0_5, %c0_6] : memref<128x128xbf16, #tpu.memory_space<vmem>>, vector<128x128xbf16>
    %c0_7 = arith.constant 0 : index
    %c0_8 = arith.constant 0 : index
    %31 = vector.load %arg5[%c0_7, %c0_8] : memref<1x128xf32, #tpu.memory_space<vmem>>, vector<1x128xf32>
    %32 = arith.truncf %29 : vector<256x128xf32> to vector<256x128xbf16>
    %cst_9 = arith.constant dense<0.000000e+00> : vector<256x128xf32>
    %33 = tpu.matmul %32, %30, %cst_9 {dimension_numbers = #tpu.dot_dimension_numbers<[1], [0], [0], [1], [0, 0, 1, 1], [], []>} : vector<256x128xbf16>, vector<128x128xbf16>, vector<256x128xf32> -> vector<256x128xf32>
    %34 = vector.broadcast %31 : vector<1x128xf32> to vector<256x128xf32>
    %35 = arith.addf %33, %34 : vector<256x128xf32>
    %cst_10 = arith.constant 0.000000e+00 : f32
    %36 = vector.broadcast %cst_10 : f32 to vector<256x128xf32>
    %37 = arith.maximumf %35, %36 : vector<256x128xf32>
    %c0_11 = arith.constant 0 : index
    %c0_12 = arith.constant 0 : index
    %38 = vector.load %arg6[%c0_11, %c0_12] : memref<128x128xbf16, #tpu.memory_space<vmem>>, vector<128x128xbf16>
    %c0_13 = arith.constant 0 : index
    %c0_14 = arith.constant 0 : index
    %39 = vector.load %arg7[%c0_13, %c0_14] : memref<1x128xf32, #tpu.memory_space<vmem>>, vector<1x128xf32>
    %40 = arith.truncf %37 : vector<256x128xf32> to vector<256x128xbf16>
    %cst_15 = arith.constant dense<0.000000e+00> : vector<256x128xf32>
    %41 = tpu.matmul %40, %38, %cst_15 {dimension_numbers = #tpu.dot_dimension_numbers<[1], [0], [0], [1], [0, 0, 1, 1], [], []>} : vector<256x128xbf16>, vector<128x128xbf16>, vector<256x128xf32> -> vector<256x128xf32>
    %42 = vector.broadcast %39 : vector<1x128xf32> to vector<256x128xf32>
    %43 = arith.addf %41, %42 : vector<256x128xf32>
    %cst_16 = arith.constant 0.000000e+00 : f32
    %44 = vector.broadcast %cst_16 : f32 to vector<256x128xf32>
    %45 = arith.maximumf %43, %44 : vector<256x128xf32>
    %c0_17 = arith.constant 0 : index
    %c0_18 = arith.constant 0 : index
    %46 = vector.load %arg8[%c0_17, %c0_18] : memref<128x128xbf16, #tpu.memory_space<vmem>>, vector<128x128xbf16>
    %c0_19 = arith.constant 0 : index
    %c0_20 = arith.constant 0 : index
    %47 = vector.load %arg9[%c0_19, %c0_20] : memref<1x128xf32, #tpu.memory_space<vmem>>, vector<1x128xf32>
    %48 = arith.truncf %45 : vector<256x128xf32> to vector<256x128xbf16>
    %cst_21 = arith.constant dense<0.000000e+00> : vector<256x128xf32>
    %49 = tpu.matmul %48, %46, %cst_21 {dimension_numbers = #tpu.dot_dimension_numbers<[1], [0], [0], [1], [0, 0, 1, 1], [], []>} : vector<256x128xbf16>, vector<128x128xbf16>, vector<256x128xf32> -> vector<256x128xf32>
    %50 = vector.broadcast %47 : vector<1x128xf32> to vector<256x128xf32>
    %51 = arith.addf %49, %50 : vector<256x128xf32>
    %52 = vector.extract_strided_slice %51 {offsets = [0, 0], sizes = [256, 2], strides = [1, 1]} : vector<256x128xf32> to vector<256x2xf32>
    %c0_22 = arith.constant 0 : index
    %c0_23 = arith.constant 0 : index
    %53 = vector.load %arg10[%c0_22, %c0_23] : memref<256x2xf32, #tpu.memory_space<vmem>>, vector<256x2xf32>
    tpu.vector_store %arg10[%c0_22, %c0_23], %52 {strides = array<i32>} : memref<256x2xf32, #tpu.memory_space<vmem>>, vector<256x2xf32>,
    return
  }
  func.func @transform_0(%arg0: i32) -> (i32, i32) {
    %c0_i32 = arith.constant 0 : i32
    %c0_i32_0 = arith.constant 0 : i32
    return %arg0, %c0_i32 : i32, i32
  }
  func.func @transform_1(%arg0: i32) -> (i32, i32) {
    %c0_i32 = arith.constant 0 : i32
    %c0_i32_0 = arith.constant 0 : i32
    %c0_i32_1 = arith.constant 0 : i32
    return %c0_i32, %c0_i32_0 : i32, i32
  }
  func.func @transform_2(%arg0: i32) -> (i32, i32) {
    %c0_i32 = arith.constant 0 : i32
    %c0_i32_0 = arith.constant 0 : i32
    %c0_i32_1 = arith.constant 0 : i32
    return %c0_i32, %c0_i32_0 : i32, i32
  }
  func.func @transform_3(%arg0: i32) -> (i32, i32) {
    %c0_i32 = arith.constant 0 : i32
    %c0_i32_0 = arith.constant 0 : i32
    %c0_i32_1 = arith.constant 0 : i32
    return %c0_i32, %c0_i32_0 : i32, i32
  }
  func.func @transform_4(%arg0: i32) -> (i32, i32) {
    %c0_i32 = arith.constant 0 : i32
    %c0_i32_0 = arith.constant 0 : i32
    %c0_i32_1 = arith.constant 0 : i32
    return %c0_i32, %c0_i32_0 : i32, i32
  }
  func.func @transform_5(%arg0: i32) -> (i32, i32) {
    %c0_i32 = arith.constant 0 : i32
    %c0_i32_0 = arith.constant 0 : i32
    %c0_i32_1 = arith.constant 0 : i32
    return %c0_i32, %c0_i32_0 : i32, i32
  }
  func.func @transform_6(%arg0: i32) -> (i32, i32) {
    %c0_i32 = arith.constant 0 : i32
    %c0_i32_0 = arith.constant 0 : i32
    %c0_i32_1 = arith.constant 0 : i32
    return %c0_i32, %c0_i32_0 : i32, i32
  }
  func.func @transform_7(%arg0: i32) -> (i32, i32) {
    %c0_i32 = arith.constant 0 : i32
    %c0_i32_0 = arith.constant 0 : i32
    %c0_i32_1 = arith.constant 0 : i32
    return %c0_i32, %c0_i32_0 : i32, i32
  }
  func.func @transform_8(%arg0: i32) -> (i32, i32) {
    %c0_i32 = arith.constant 0 : i32
    %c0_i32_0 = arith.constant 0 : i32
    %c0_i32_1 = arith.constant 0 : i32
    return %c0_i32, %c0_i32_0 : i32, i32
  }
  func.func @transform_9(%arg0: i32) -> (i32, i32) {
    %c0_i32 = arith.constant 0 : i32
    %c0_i32_0 = arith.constant 0 : i32
    return %arg0, %c0_i32 : i32, i32
  }
}

</mosaic_0001>

<bundles_post_ra>
// kernel: fnn_forward.1
= control target key start
LH: loop header
LB: loop body
LE: loop exit
PB: predicated region body
PF: predicated region fallthrough
CT: control target
= control target key end

     0   :  { %v3152_v0 = vmov 0   ;;  %v3156_v6 = vmov 1   ;;  %v3154_v9 = vmov 2   ;;  %v3150_v14 = vmov 3   ;;  %s3140_s0 = inlined_call_operand.vmem [shape: f32[256,4], index: 0, kind: input, shape index: {}]   ;;  %s3141_s3 = inlined_call_operand.vmem [shape: bf16[128,128], index: 3, kind: input, shape index: {}]   ;;  %s3142_s1 = inlined_call_operand.vmem [shape: f32[4,128], index: 1, kind: input, shape index: {}]   ;;  %s3143_s2 = inlined_call_operand.vmem [shape: f32[1,128], index: 2, kind: input, shape index: {}]   ;;  %s3144_s5 = inlined_call_operand.vmem [shape: bf16[128,128], index: 5, kind: input, shape index: {}]   ;;  %s3145_s4 = inlined_call_operand.vmem [shape: f32[1,128], index: 4, kind: input, shape index: {}]   ;;  %s3146_s7 = inlined_call_operand.vmem [shape: bf16[128,128], index: 7, kind: input, shape index: {}]   ;;  %s3147_s6 = inlined_call_operand.vmem [shape: f32[1,128], index: 6, kind: input, shape index: {}]   ;;  %s3148_s8 = inlined_call_operand.vmem [shape: f32[1,128], index: 8, kind: input, shape index: {}]   ;;  %s3149_s9 = inlined_call_operand.vmem [shape: f32[256,2], index: 9, kind: output, shape index: {}]  }
   0x1   :  { %2031 = vset.pattern.permute.xlu1 %v3152_v0  ;;  %2030 = vset.pattern.permute.xlu0 %v3152_v0  ;;  %v35_v1 = vld [vmem:[%s3140_s0 + $0x10] sm:$0xff]  ;;  %v2154_v2 = vld [vmem:[%s3140_s0] sm:$0xff]  ;;  %v2160_v3 = vld [vmem:[%s3140_s0 + $0x18] sm:$0xff]  ;;  %v227_v49 = vlaneseq  ;;  %vm1729_vm0 = vcmask 15360  }
   0x2   :  { %79 = vperm.xlu1 %2031, %v35_v1   ;;  %69 = vperm.xlu0 %2030, %v2154_v2   ;;  %v2165_v4 = vld [vmem:[%s3140_s0 + $0x8] sm:$0xff]  ;;  %v2223_v15 = vld [vmem:[%s3140_s0 + $0x20] sm:$0xff]  ;;  %v39_v16 = vld [vmem:[%s3140_s0 + $0x30] sm:$0xff] }
   0x3   :  { %v2172_v5 = vld [vmem:[%s3140_s0 + $0x28] sm:$0xff]  ;;  %v2235_v17 = vld [vmem:[%s3140_s0 + $0x38] sm:$0xff]  ;;  %v2242_v18 = vld [vmem:[%s3140_s0 + $0x40] sm:$0xff]  ;;  %v2403_v52 = vshrl.u32 %v227_v49, 7 }
   0x4   :  { %v2180_v7 = vld [vmem:[%s3140_s0 + $0x48] sm:$0xff]  ;;  %v2250_v19 = vld [vmem:[%s3140_s0 + $0x58] sm:$0xff]  ;;  %v2256_v20 = vld [vmem:[%s3140_s0 + $0x60] sm:$0xff] }
   0x5   :  { %v2186_v8 = vld [vmem:[%s3140_s0 + $0x68] sm:$0xff]  ;;  %v2264_v21 = vld [vmem:[%s3140_s0 + $0x78] sm:$0xff]  ;;  %v2270_v22 = vld [vmem:[%s3140_s0 + $0x80] sm:$0xff]  ;;  %v229_v55 = vsub.s32 0, %v2403_v52  ;;  %v431_v62 = vsub.s32 1, %v2403_v52 }
   0x6   :  { %84 = vperm.xlu1 %2031, %v2160_v3   ;;  %74 = vperm.xlu0 %2030, %v2165_v4   ;;  %v2193_v10 = vld [vmem:[%s3140_s0 + $0x88] sm:$0xff]  ;;  %v2277_v23 = vld [vmem:[%s3140_s0 + $0x98] sm:$0xff]  ;;  %v2284_v24 = vld [vmem:[%s3140_s0 + $0xa0] sm:$0xff] }
   0x7   :  { %v2200_v11 = vld [vmem:[%s3140_s0 + $0xa8] sm:$0xff]  ;;  %v2291_v25 = vld [vmem:[%s3140_s0 + $0xb8] sm:$0xff]  ;;  %v2297_v26 = vld [vmem:[%s3140_s0 + $0xc0] sm:$0xff] }
   0x8   :  { %v2206_v12 = vld [vmem:[%s3140_s0 + $0xc8] sm:$0xff]  ;;  %v43_v27 = vld [vmem:[%s3140_s0 + $0x50] sm:$0xff]  ;;  %v2308_v28 = vld [vmem:[%s3140_s0 + $0xd8] sm:$0xff] }
   0x9   :  { %v2213_v13 = vld [vmem:[%s3140_s0 + $0xe8] sm:$0xff]  ;;  %v2314_v29 = vld [vmem:[%s3140_s0 + $0xe0] sm:$0xff]  ;;  %v2321_v30 = vld [vmem:[%s3140_s0 + $0xf8] sm:$0xff] }
   0xa   :  { %2032 = vset.pattern.permute.xlu1 %v3156_v6  ;;  %94 = vperm.xlu0 %2030, %v2172_v5   ;;  %3163 = vst [vmem:[#allocation2_spill] sm:$0xff] %v2213_v13  ;;  %3164 = vst [vmem:[#allocation3_spill] sm:$0xff] %v2314_v29  ;;  %v2066_v31 = vld [vmem:[%s3141_s3] sm:$0xff]   ;;  %v2067_v32 = vld [vmem:[%s3141_s3 + $0x8] sm:$0xff]  }
   0xb   :  { %306 = vperm.xlu1 %2032, %v2165_v4   ;;  %3165 = vst [vmem:[#allocation4_spill] sm:$0xff] %v2321_v30  ;;  %1866 = vmatprep.subr.bf16.mxu0 %v2066_v31  ;;  %v2068_v33 = vld [vmem:[%s3141_s3 + $0x10] sm:$0xff]   ;;  %v2069_v34 = vld [vmem:[%s3141_s3 + $0x18] sm:$0xff]   ;;  %v2070_v38 = vld [vmem:[%s3141_s3 + $0x20] sm:$0xff]  }
   0xc   :  { %2010 = vmatprep.subr.bf16.mxu1 %v2066_v31  ;;  %1867 = vmatpush3.bf16.msra.mxu0 %v2066_v31  ;;  %v2360_v37 = vld [vmem:[%s3140_s0 + $0x70] sm:$0xff]  ;;  %v2071_v41 = vld [vmem:[%s3141_s3 + $0x28] sm:$0xff]   ;;  %v2073_v47 = vld [vmem:[%s3141_s3 + $0x38] sm:$0xff]  }
   0xd   :  { %2018 = vmatpush3.bf16.msra.mxu1 %v2066_v31  ;;  %1868 = vmatprep.subr.bf16.mxu0 %v2067_v32  ;;  %v2072_v44 = vld [vmem:[%s3141_s3 + $0x30] sm:$0xff]   ;;  %v2418_v57 = vld [vmem:[%s3142_s1] sm:$0xf] }
   0xe   :  { %114 = vperm.xlu0 %2030, %v2180_v7   ;;  %2011 = vmatprep.subr.bf16.mxu1 %v2067_v32  ;;  %v2425_v59 = vrot.slane %v2418_v57, %v229_v55 }
   0xf   :  { %310 = vperm.xlu1 %2032, %v35_v1  }
  0x10   :  { %1869 = vmatpush3.bf16.msra.mxu0 %v2067_v32 }
  0x11   :  { %2019 = vmatpush3.bf16.msra.mxu1 %v2067_v32  ;;  %1870 = vmatprep.subr.bf16.mxu0 %v2068_v33 }
  0x12   :  { %134 = vperm.xlu0 %2030, %v2186_v8   ;;  %2012 = vmatprep.subr.bf16.mxu1 %v2068_v33 }
  0x13   :  { %2033 = vset.pattern.permute.xlu1 %v3154_v9 }
  0x14   :  { %498 = vperm.xlu1 %2033, %v2154_v2   ;;  %1871 = vmatpush3.bf16.msra.mxu0 %v2068_v33 }
  0x15   :  { %2020 = vmatpush3.bf16.msra.mxu1 %v2068_v33  ;;  %1872 = vmatprep.subr.bf16.mxu0 %v2069_v34 }
  0x16   :  { %154 = vperm.xlu0 %2030, %v2193_v10   ;;  %2013 = vmatprep.subr.bf16.mxu1 %v2069_v34 }
  0x18   :  { %506 = vperm.xlu1 %2033, %v35_v1   ;;  %1873 = vmatpush3.bf16.msra.mxu0 %v2069_v34 }
  0x19   :  { %2021 = vmatpush3.bf16.msra.mxu1 %v2069_v34  ;;  %1874 = vmatprep.subr.bf16.mxu0 %v2070_v38 }
  0x1a   :  { %174 = vperm.xlu0 %2030, %v2200_v11   ;;  %2014 = vmatprep.subr.bf16.mxu1 %v2070_v38 }
  0x1c   :  { %510 = vperm.xlu1 %2033, %v2160_v3   ;;  %1875 = vmatpush3.bf16.msra.mxu0 %v2070_v38 }
  0x1d   :  { %2022 = vmatpush3.bf16.msra.mxu1 %v2070_v38  ;;  %1876 = vmatprep.subr.bf16.mxu0 %v2071_v41 }
  0x1e   :  { %194 = vperm.xlu0 %2030, %v2206_v12   ;;  %2015 = vmatprep.subr.bf16.mxu1 %v2071_v41 }
  0x20   :  { %2034 = vset.pattern.permute.xlu1 %v3150_v14  ;;  %1877 = vmatpush3.bf16.msra.mxu0 %v2071_v41 }
  0x21   :  { %698 = vperm.xlu1 %2034, %v2165_v4   ;;  %2023 = vmatpush3.bf16.msra.mxu1 %v2071_v41 }
  0x22   :  { %214 = vperm.xlu0 %2030, %v2213_v13   ;;  %1878 = vmatprep.subr.bf16.mxu0 %v2072_v44 }
  0x23   :  { %2016 = vmatprep.subr.bf16.mxu1 %v2072_v44 }
  0x24   :  { %1879 = vmatpush3.bf16.msra.mxu0 %v2072_v44 }
  0x25   :  { %702 = vperm.xlu1 %2034, %v35_v1   ;;  %2024 = vmatpush3.bf16.msra.mxu1 %v2072_v44  ;;  %v2439_v1 = vld [vmem:[%s3143_s2] ss:$0 sm:$0xff] }
  0x26   :  { %2060 = vset.pattern.permute.xlu0 %v3156_v6  ;;  %1880 = vmatprep.subr.bf16.mxu0 %v2073_v47 }
  0x27   :  { %302 = vperm.xlu0 %2060, %v2154_v2   ;;  %2017 = vmatprep.subr.bf16.mxu1 %v2073_v47 }
  0x28   :  { %1881 = vmatpush3.bf16.msra.mxu0 %v2073_v47 }
  0x29   :  { %2035 = vset.pattern.permute.xlu1 %v3152_v0  ;;  %2025 = vmatpush3.bf16.msra.mxu1 %v2073_v47 }
  0x2a   :  { %89 = vperm.xlu1 %2035, %v2223_v15  }
  0x2b   :  { %314 = vperm.xlu0 %2060, %v2160_v3  }
  0x2e   :  { %99 = vperm.xlu1 %2035, %v39_v16  }
  0x2f   :  { %318 = vperm.xlu0 %2060, %v2223_v15  }
  0x32   :  { %104 = vperm.xlu1 %2035, %v2235_v17  }
  0x33   :  { %330 = vperm.xlu0 %2060, %v2235_v17  }
  0x36   :  { %2036 = vset.pattern.permute.xlu1 %v3156_v6 }
  0x37   :  { %322 = vperm.xlu1 %2036, %v2172_v5   ;;  %334 = vperm.xlu0 %2060, %v2242_v18  }
  0x3b   :  { %326 = vperm.xlu1 %2036, %v39_v16   ;;  %346 = vperm.xlu0 %2060, %v2250_v19  }
  0x3f   :  { %2037 = vset.pattern.permute.xlu1 %v3154_v9  ;;  %350 = vperm.xlu0 %2060, %v2256_v20  }
  0x40   :  { %514 = vperm.xlu1 %2037, %v2223_v15  }
  0x43   :  { %362 = vperm.xlu0 %2060, %v2264_v21  }
  0x44   :  { %522 = vperm.xlu1 %2037, %v39_v16  }
  0x47   :  { %366 = vperm.xlu0 %2060, %v2270_v22  }
  0x48   :  { %526 = vperm.xlu1 %2037, %v2235_v17  }
  0x4b   :  { %378 = vperm.xlu0 %2060, %v2277_v23  }
  0x4c   :  { %2038 = vset.pattern.permute.xlu1 %v3150_v14 }
  0x4d   :  { %714 = vperm.xlu1 %2038, %v2172_v5  }
  0x4f   :  { %382 = vperm.xlu0 %2060, %v2284_v24  }
  0x51   :  { %718 = vperm.xlu1 %2038, %v39_v16  }
  0x53   :  { %394 = vperm.xlu0 %2060, %v2291_v25  }
  0x55   :  { %2039 = vset.pattern.permute.xlu1 %v3152_v0 }
  0x56   :  { %109 = vperm.xlu1 %2039, %v2242_v18  }
  0x57   :  { %398 = vperm.xlu0 %2060, %v2297_v26  }
  0x5a   :  { %119 = vperm.xlu1 %2039, %v43_v27  }
  0x5b   :  { %410 = vperm.xlu0 %2060, %v2308_v28  }
  0x5e   :  { %124 = vperm.xlu1 %2039, %v2250_v19  }
  0x5f   :  { %414 = vperm.xlu0 %2060, %v2314_v29  }
  0x62   :  { %2040 = vset.pattern.permute.xlu1 %v3156_v6 }
  0x63   :  { %338 = vperm.xlu1 %2040, %v2180_v7   ;;  %426 = vperm.xlu0 %2060, %v2321_v30  }
  0x67   :  { %342 = vperm.xlu1 %2040, %v43_v27   ;;  %2062 = vset.pattern.permute.xlu0 %v3154_v9 }
  0x68   :  { %502 = vperm.xlu0 %2062, %v2165_v4   ;;  %v2446_v4 = vrot.slane %v2418_v57, %v431_v62 }
  0x6b   :  { %2041 = vset.pattern.permute.xlu1 %v3154_v9 }
  0x6c   :  { %530 = vperm.xlu1 %2041, %v2242_v18   ;;  %518 = vperm.xlu0 %2062, %v2172_v5  }
  0x70   :  { %538 = vperm.xlu1 %2041, %v43_v27   ;;  %534 = vperm.xlu0 %2062, %v2180_v7  }
  0x74   :  { %542 = vperm.xlu1 %2041, %v2250_v19   ;;  %550 = vperm.xlu0 %2062, %v2186_v8  }
  0x78   :  { %2042 = vset.pattern.permute.xlu1 %v3150_v14  ;;  %566 = vperm.xlu0 %2062, %v2193_v10  }
  0x79   :  { %730 = vperm.xlu1 %2042, %v2180_v7  }
  0x7c   :  { %582 = vperm.xlu0 %2062, %v2200_v11  }
  0x7d   :  { %734 = vperm.xlu1 %2042, %v43_v27  }
  0x80   :  { %598 = vperm.xlu0 %2062, %v2206_v12  }
  0x81   :  { %v2351_v35 = vpop.permute.xlu1 %79  ;;  %2043 = vset.pattern.permute.xlu1 %v3152_v0  ;;  %v2354_v36 = vpop.permute.xlu0 %69 }
  0x82   :  { %129 = vperm.xlu1 %2043, %v2256_v20   ;;  %v231_v61 = vmul.f32 %v2425_v59, %v2354_v36 }
  0x84   :  { %614 = vperm.xlu0 %2062, %v2213_v13  }
  0x85   :  { %v2366_v39 = vpop.permute.xlu1 %84  ;;  %v2368_v40 = vpop.permute.xlu0 %74 }
  0x86   :  { %139 = vperm.xlu1 %2043, %v2360_v37  }
  0x88   :  { %2064 = vset.pattern.permute.xlu0 %v3150_v14 }
  0x89   :  { %694 = vperm.xlu0 %2064, %v2154_v2   ;;  %v2376_v42 = vpop.permute.xlu0 %94 }
  0x8a   :  { %v2378_v43 = vpop.permute.xlu1 %306  ;;  %144 = vperm.xlu1 %2043, %v2264_v21  }
  0x8d   :  { %706 = vperm.xlu0 %2064, %v2160_v3   ;;  %v2385_v45 = vpop.permute.xlu0 %114  ;;  %v269_v3 = vadd.f32 %v2439_v1, %v231_v61 }
  0x8e   :  { %v2387_v46 = vpop.permute.xlu1 %310  ;;  %2044 = vset.pattern.permute.xlu1 %v3156_v6 }
  0x8f   :  { %354 = vperm.xlu1 %2044, %v2186_v8  }
  0x91   :  { %710 = vperm.xlu0 %2064, %v2223_v15   ;;  %v2395_v48 = vpop.permute.xlu0 %134 }
  0x93   :  { %358 = vperm.xlu1 %2044, %v2360_v37   ;;  %v2398_v50 = vpop.permute.xlu1 %498 }
  0x95   :  { %722 = vperm.xlu0 %2064, %v2235_v17   ;;  %v2401_v51 = vpop.permute.xlu0 %154 }
  0x96   :  { %3166 = vst [vmem:[#allocation5_spill] sm:$0xff] %v2401_v51 }
  0x97   :  { %2045 = vset.pattern.permute.xlu1 %v3154_v9  ;;  %v2406_v53 = vpop.permute.xlu1 %506 }
  0x98   :  { %546 = vperm.xlu1 %2045, %v2256_v20  }
  0x99   :  { %726 = vperm.xlu0 %2064, %v2242_v18   ;;  %v2410_v54 = vpop.permute.xlu0 %174 }
  0x9a   :  { %3167 = vst [vmem:[#allocation6_spill] sm:$0xff] %v2410_v54 }
  0x9b   :  { %v2413_v56 = vpop.permute.xlu1 %510 }
  0x9c   :  { %554 = vperm.xlu1 %2045, %v2360_v37  }
  0x9d   :  { %738 = vperm.xlu0 %2064, %v2250_v19   ;;  %v2422_v58 = vpop.permute.xlu0 %194  ;;  %v51_v19 = vld [vmem:[%s3140_s0 + $0x90] sm:$0xff] }
  0x9e   :  { %3168 = vst [vmem:[#allocation7_spill] sm:$0xff] %v2422_v58  ;;  %v3179_v58 = vmov 2  }
  0xa0   :  { %558 = vperm.xlu1 %2045, %v2264_v21   ;;  %v2428_v60 = vpop.permute.xlu1 %698 }
  0xa1   :  { %742 = vperm.xlu0 %2064, %v2256_v20   ;;  %v2434_v63 = vpop.permute.xlu0 %214 }
  0xa2   :  { %3169 = vst [vmem:[#allocation8_spill] sm:$0xff] %v2434_v63 }
  0xa4   :  { %2046 = vset.pattern.permute.xlu1 %v3150_v14  ;;  %v2442_v2 = vpop.permute.xlu1 %702 }
  0xa5   :  { %746 = vperm.xlu1 %2046, %v2186_v8   ;;  %754 = vperm.xlu0 %2064, %v2264_v21  }
  0xa6   :  { %v303_v5 = vpop.permute.xlu0 %302 }
  0xa7   :  { %v433_v7 = vmul.f32 %v2446_v4, %v303_v5 }
  0xa9   :  { %v2451_v15 = vadd.f32 %v433_v7, %v269_v3  ;;  %750 = vperm.xlu1 %2046, %v2360_v37   ;;  %v2454_v16 = vpop.permute.xlu1 %89  ;;  %758 = vperm.xlu0 %2064, %v2270_v22   ;;  %v55_v7 = vld [vmem:[%s3140_s0 + $0xb0] sm:$0xff] }
  0xaa   :  { %v2457_v17 = vpop.permute.xlu0 %314 }
  0xad   :  { %2047 = vset.pattern.permute.xlu1 %v3152_v0  ;;  %v2460_v18 = vpop.permute.xlu1 %99  ;;  %770 = vperm.xlu0 %2064, %v2277_v23  }
  0xae   :  { %149 = vperm.xlu1 %2047, %v2270_v22   ;;  %v2464_v8 = vpop.permute.xlu0 %318 }
  0xb1   :  { %v2469_v20 = vpop.permute.xlu1 %104  ;;  %774 = vperm.xlu0 %2064, %v2284_v24  }
  0xb2   :  { %159 = vperm.xlu1 %2047, %v51_v19   ;;  %v2472_v21 = vpop.permute.xlu0 %330 }
  0xb5   :  { %786 = vperm.xlu0 %2064, %v2291_v25  }
  0xb6   :  { %164 = vperm.xlu1 %2047, %v2277_v23   ;;  %v2476_v27 = vpop.permute.xlu1 %322  ;;  %v2478_v31 = vpop.permute.xlu0 %334 }
  0xb9   :  { %790 = vperm.xlu0 %2064, %v2297_v26  }
  0xba   :  { %2048 = vset.pattern.permute.xlu1 %v3156_v6  ;;  %v2482_v32 = vpop.permute.xlu1 %326  ;;  %v2484_v33 = vpop.permute.xlu0 %346 }
  0xbb   :  { %370 = vperm.xlu1 %2048, %v2193_v10  }
  0xbd   :  { %802 = vperm.xlu0 %2064, %v2308_v28  }
  0xbe   :  { %v2488_v34 = vpop.permute.xlu0 %350 }
  0xbf   :  { %374 = vperm.xlu1 %2048, %v51_v19   ;;  %v2490_v36 = vpop.permute.xlu1 %514 }
  0xc1   :  { %806 = vperm.xlu0 %2064, %v2314_v29   ;;  %v435_v29 = vmul.f32 %v2446_v4, %v2387_v46 }
  0xc2   :  { %v2493_v37 = vpop.permute.xlu0 %362 }
  0xc3   :  { %3170 = vst [vmem:[#allocation9_spill] sm:$0xff] %v2493_v37  ;;  %2049 = vset.pattern.permute.xlu1 %v3154_v9  ;;  %v2496_v38 = vpop.permute.xlu1 %522  ;;  %v3186_v37 = vmov 0  }
  0xc4   :  { %562 = vperm.xlu1 %2049, %v2270_v22  }
  0xc5   :  { %818 = vperm.xlu0 %2064, %v2321_v30   ;;  %v3183_v30 = vmov 3  }
  0xc6   :  { %v2500_v41 = vpop.permute.xlu0 %366 }
  0xc7   :  { %3171 = vst [vmem:[#allocation10_spill] sm:$0xff] %v2500_v41  ;;  %v2502_v44 = vpop.permute.xlu1 %526  ;;  %v627_v41 = vsub.s32 2, %v2403_v52 }
  0xc8   :  { %570 = vperm.xlu1 %2049, %v51_v19  }
  0xca   :  { %v2504_v47 = vpop.permute.xlu0 %378 }
  0xcb   :  { %3172 = vst [vmem:[#allocation11_spill] sm:$0xff] %v2504_v47  ;;  %v232_v47 = vmul.f32 %v2425_v59, %v2368_v40  ;;  %v434_v40 = vmul.f32 %v2446_v4, %v2378_v43 }
  0xcc   :  { %574 = vperm.xlu1 %2049, %v2277_v23   ;;  %v2507_v49 = vpop.permute.xlu1 %714 }
  0xce   :  { %v2509_v55 = vpop.permute.xlu0 %382 }
  0xcf   :  { %3173 = vst [vmem:[#allocation12_spill] sm:$0xff] %v2509_v55 }
  0xd0   :  { %2050 = vset.pattern.permute.xlu1 %v3150_v14  ;;  %v2512_v61 = vpop.permute.xlu1 %718 }
  0xd1   :  { %762 = vperm.xlu1 %2050, %v2193_v10  }
  0xd2   :  { %v2515_v22 = vpop.permute.xlu0 %394 }
  0xd3   :  { %3174 = vst [vmem:[#allocation13_spill] sm:$0xff] %v2515_v22 }
  0xd5   :  { %766 = vperm.xlu1 %2050, %v51_v19   ;;  %v2517_v62 = vpop.permute.xlu1 %109 }
  0xd6   :  { %v2519_v3 = vpop.permute.xlu0 %398 }
  0xd7   :  { %3175 = vst [vmem:[#allocation14_spill] sm:$0xff] %v2519_v3 }
  0xd9   :  { %2051 = vset.pattern.permute.xlu1 %v3152_v0  ;;  %v2522_v23 = vpop.permute.xlu1 %119 }
  0xda   :  { %169 = vperm.xlu1 %2051, %v2284_v24   ;;  %v2525_v5 = vpop.permute.xlu0 %410 }
  0xdb   :  { %3176 = vst [vmem:[#allocation15_spill] sm:$0xff] %v2525_v5 }
  0xdd   :  { %v2530_v10 = vpop.permute.xlu1 %124 }
  0xde   :  { %179 = vperm.xlu1 %2051, %v55_v7   ;;  %v2532_v19 = vpop.permute.xlu0 %414 }
  0xdf   :  { %3177 = vst [vmem:[#allocation16_spill] sm:$0xff] %v2532_v19 }
  0xe2   :  { %184 = vperm.xlu1 %2051, %v2291_v25   ;;  %v2535_v14 = vpop.permute.xlu1 %338  ;;  %v2537_v0 = vpop.permute.xlu0 %426 }
  0xe3   :  { %3178 = vst [vmem:[#allocation17_spill] sm:$0xff] %v2537_v0 }
  0xe6   :  { %2052 = vset.pattern.permute.xlu1 %v3156_v6  ;;  %v2540_v9 = vpop.permute.xlu1 %342 }
  0xe7   :  { %386 = vperm.xlu1 %2052, %v2200_v11   ;;  %v503_v63 = vpop.permute.xlu0 %502 }
  0xeb   :  { %390 = vperm.xlu1 %2052, %v55_v7   ;;  %v2543_v5 = vpop.permute.xlu1 %530  ;;  %v519_v3 = vpop.permute.xlu0 %518 }
  0xef   :  { %2053 = vset.pattern.permute.xlu1 %v3179_v58  ;;  %v2546_v19 = vpop.permute.xlu1 %538  ;;  %v2548_v22 = vpop.permute.xlu0 %534 }
  0xf0   :  { %578 = vperm.xlu1 %2053, %v2284_v24   ;;  %v823_v24 = vsub.s32 3, %v2403_v52 }
  0xf3   :  { %v2551_v0 = vpop.permute.xlu1 %542  ;;  %v2553_v6 = vpop.permute.xlu0 %550 }
  0xf4   :  { %3180 = vst [vmem:[#allocation18_spill] sm:$0xff] %v2553_v6  ;;  %586 = vperm.xlu1 %2053, %v55_v7  }
  0xf7   :  { %v2555_v55 = vpop.permute.xlu0 %566 }
  0xf8   :  { %3181 = vst [vmem:[#allocation19_spill] sm:$0xff] %v2555_v55  ;;  %590 = vperm.xlu1 %2053, %v2291_v25   ;;  %v2558_v54 = vpop.permute.xlu1 %730  ;;  %v233_v55 = vmul.f32 %v2425_v59, %v2351_v35  ;;  %v270_v25 = vadd.f32 %v2439_v1, %v232_v47 }
  0xfa   :  { %v271_v35 = vadd.f32 %v2439_v1, %v233_v55 }
  0xfb   :  { %v2563_v13 = vpop.permute.xlu0 %582 }
  0xfc   :  { %3182 = vst [vmem:[#allocation20_spill] sm:$0xff] %v2563_v13  ;;  %2054 = vset.pattern.permute.xlu1 %v3183_v30  ;;  %v2567_v51 = vpop.permute.xlu1 %734  ;;  %v2578_v13 = vrot.slane %v2418_v57, %v627_v41  ;;  %v2583_v30 = vrot.slane %v2418_v57, %v823_v24  ;;  %v236_v41 = vmul.f32 %v2425_v59, %v2376_v42 }
  0xfd   :  { %778 = vperm.xlu1 %2054, %v2200_v11   ;;  %v234_v11 = vmul.f32 %v2425_v59, %v2366_v39  ;;  %v240_v57 = vmul.f32 %v2425_v59, %v2385_v45  ;;  %v466_v24 = vadd.f32 %v434_v40, %v270_v25  ;;  %v238_v25 = vmul.f32 %v2425_v59, %v2469_v20 }
  0xfe   :  { %v631_v47 = vmul.f32 %v2578_v13, %v2406_v53  ;;  %v630_v43 = vmul.f32 %v2578_v13, %v503_v63  ;;  %v827_v55 = vmul.f32 %v2583_v30, %v2442_v2  ;;  %v436_v53 = vmul.f32 %v2446_v4, %v2457_v17 }
  0xff   :  { %v2580_v52 = vpop.permute.xlu0 %598  ;;  %v272_v63 = vadd.f32 %v2439_v1, %v234_v11  ;;  %v274_v45 = vadd.f32 %v2439_v1, %v236_v41  ;;  %v629_v2 = vmul.f32 %v2578_v13, %v2398_v50  ;;  %v826_v17 = vmul.f32 %v2583_v30, %v2428_v60  ;;  %v2627_v50 = vld [vmem:[%s3140_s0 + $0xd0] sm:$0xff] }
 0x100   :  { %3184 = vst [vmem:[#allocation21_spill] sm:$0xff] %v2580_v52  ;;  %v467_v52 = vadd.f32 %v435_v29, %v271_v35  ;;  %v662_v6 = vadd.f32 %v630_v43, %v466_v24  ;;  %v2609_v29 = vadd.f32 %v2439_v1, %v240_v57  ;;  %v438_v35 = vmul.f32 %v2446_v4, %v2476_v27 }
 0x101   :  { %782 = vperm.xlu1 %2054, %v55_v7   ;;  %v2591_v46 = vpop.permute.xlu1 %129  ;;  %v2631_v20 = vmul.f32 %v2425_v59, %v2395_v48  ;;  %v632_v60 = vmul.f32 %v2578_v13, %v2413_v56  ;;  %v468_v11 = vadd.f32 %v436_v53, %v272_v63  ;;  %v634_v43 = vmul.f32 %v2578_v13, %v519_v3 }
 0x102   :  { %v663_v7 = vadd.f32 %v631_v47, %v467_v52  ;;  %v235_v52 = vmul.f32 %v2425_v59, %v2454_v16  ;;  %v237_v47 = vmul.f32 %v2425_v59, %v2460_v18  ;;  %v661_v57 = vadd.f32 %v629_v2, %v2451_v15 }
 0x103   :  { %v2599_v39 = vpop.permute.xlu0 %614  ;;  %v858_v24 = vadd.f32 %v826_v17, %v662_v6  ;;  %v437_v48 = vmul.f32 %v2446_v4, %v2464_v8  ;;  %v440_v56 = vmul.f32 %v2446_v4, %v2472_v21  ;;  %v439_v18 = vmul.f32 %v2446_v4, %v2482_v32 }
 0x104   :  { %3185 = vst [vmem:[#allocation22_spill] sm:$0xff] %v2599_v39  ;;  %v2618_v40 = vadd.f32 %v827_v55, %v663_v7  ;;  %v276_v55 = vadd.f32 %v2439_v1, %v238_v25  ;;  %v273_v53 = vadd.f32 %v2439_v1, %v235_v52  ;;  %v470_v63 = vadd.f32 %v438_v35, %v274_v45 }
 0x105   :  { %2055 = vset.pattern.permute.xlu1 %v3186_v37  ;;  %v2605_v42 = vpop.permute.xlu1 %139  ;;  %v275_v6 = vadd.f32 %v2439_v1, %v237_v47  ;;  %v633_v8 = vmul.f32 %v2578_v13, %v2490_v36  ;;  %v635_v7 = vmul.f32 %v2578_v13, %v2496_v38  ;;  %v664_v21 = vadd.f32 %v632_v60, %v468_v11 }
 0x106   :  { %189 = vperm.xlu1 %2055, %v2297_v26   ;;  %v891_v3 = vmax.f32 %v2618_v40, 0.0  ;;  %v666_v25 = vadd.f32 %v634_v43, %v470_v63  ;;  %v469_v40 = vadd.f32 %v437_v48, %v273_v53  ;;  %v472_v39 = vadd.f32 %v440_v56, %v276_v55 }
 0x107   :  { %v471_v52 = vadd.f32 %v439_v18, %v275_v6  ;;  %v830_v45 = vmul.f32 %v2583_v30, %v2507_v49  ;;  %v831_v36 = vmul.f32 %v2583_v30, %v2512_v61  ;;  %v239_v38 = vmul.f32 %v2425_v59, %v2517_v62 }
 0x108   :  { %v695_v16 = vpop.permute.xlu0 %694  ;;  %v441_v47 = vmul.f32 %v2446_v4, %v2478_v31  ;;  %v665_v43 = vadd.f32 %v633_v8, %v469_v40  ;;  %v442_v49 = vmul.f32 %v2446_v4, %v2535_v14  ;;  %v444_v62 = vmul.f32 %v2446_v4, %v2484_v33 }
 0x109   :  { %v825_v27 = vmul.f32 %v2583_v30, %v695_v16  ;;  %v2639_v41 = vpop.permute.xlu1 %144  ;;  %v890_v16 = vmax.f32 %v858_v24, 0.0  ;;  %v667_v24 = vadd.f32 %v635_v7, %v471_v52  ;;  %v862_v48 = vadd.f32 %v830_v45, %v666_v25 }
 0x10a   :  { %199 = vperm.xlu1 %2055, %v2627_v50   ;;  %v241_v31 = vmul.f32 %v2425_v59, %v2522_v23  ;;  %v242_v56 = vmul.f32 %v2425_v59, %v2530_v10  ;;  %v3187_v14 = vmov 1   ;;  %v277_v63 = vadd.f32 %v2439_v1, %v239_v38 }
 0x10b   :  { %v857_v15 = vadd.f32 %v825_v27, %v661_v57  ;;  %v636_v27 = vmul.f32 %v2578_v13, %v2502_v44  ;;  %v638_v44 = vmul.f32 %v2578_v13, %v2548_v22  ;;  %v863_v53 = vadd.f32 %v831_v36, %v667_v24 }
 0x10c   :  { %v707_v2 = vpop.permute.xlu0 %706  ;;  %v474_v23 = vadd.f32 %v442_v49, %v2609_v29  ;;  %v443_v10 = vmul.f32 %v2446_v4, %v2540_v9  ;;  %v834_v22 = vmul.f32 %v2583_v30, %v2558_v54  ;;  %v637_v7 = vmul.f32 %v2578_v13, %v2543_v5 }
 0x10d   :  { %v828_v32 = vmul.f32 %v2583_v30, %v707_v2  ;;  %v889_v17 = vmax.f32 %v857_v15, 0.0  ;;  %v668_v6 = vadd.f32 %v636_v27, %v472_v39  ;;  %v280_v39 = vadd.f32 %v2439_v1, %v242_v56 }
 0x10e   :  { %204 = vperm.xlu1 %2055, %v2308_v28   ;;  %v2661_v35 = vpop.permute.xlu1 %354  ;;  %v639_v29 = vmul.f32 %v2578_v13, %v2546_v19  ;;  %v670_v9 = vadd.f32 %v638_v44, %v474_v23  ;;  %v640_v52 = vmul.f32 %v2578_v13, %v2551_v0  ;;  %v835_v36 = vmul.f32 %v2583_v30, %v2567_v51  ;;  %v3188_v44 = vld [vmem:[#allocation9_spill] sm:$0xff] }
 0x10f   :  { %v860_v60 = vadd.f32 %v828_v32, %v664_v21  ;;  %v938_v11 = vpack.c.bf16 %v890_v16, %v889_v17  ;;  %v894_v21 = vmax.f32 %v862_v48, 0.0  ;;  %v895_v32 = vmax.f32 %v863_v53, 0.0 }
 0x110   :  { %v711_v57 = vpop.permute.xlu0 %710  ;;  %v473_v17 = vadd.f32 %v441_v47, %v277_v63  ;;  %v866_v45 = vadd.f32 %v834_v22, %v670_v9  ;;  %v243_v19 = vmul.f32 %v2425_v59, %v2591_v46  ;;  %v476_v27 = vadd.f32 %v444_v62, %v280_v39 }
 0x111   :  { %v892_v55 = vmax.f32 %v860_v60, 0.0  ;;  %v829_v61 = vmul.f32 %v2583_v30, %v711_v57  ;;  %1882 = vmatprep.mubr.bf16.mxu0 %v938_v11  ;;  %v282_v49 = vadd.f32 %v2439_v1, %v2631_v20  ;;  %v445_v0 = vmul.f32 %v2446_v4, %v2488_v34 }
 0x112   :  { %2056 = vset.pattern.permute.xlu1 %v3187_v14  ;;  %v2683_v18 = vpop.permute.xlu1 %358  ;;  %v669_v60 = vadd.f32 %v637_v7, %v473_v17  ;;  %v672_v48 = vadd.f32 %v640_v52, %v476_v27  ;;  %v446_v20 = vmul.f32 %v2446_v4, %v2661_v35  ;;  %v448_v53 = vmul.f32 %v2446_v4, %v3188_v44 }
 0x113   :  { %v861_v15 = vadd.f32 %v829_v61, %v665_v43  ;;  %402 = vperm.xlu1 %2056, %v2206_v12   ;;  %v939_v33 = vpack.c.bf16 %v892_v55, %v891_v3  ;;  %v279_v3 = vadd.f32 %v2439_v1, %v241_v31  ;;  %v898_v55 = vmax.f32 %v866_v45, 0.0 }
 0x114   :  { %v723_v8 = vpop.permute.xlu0 %722  ;;  %v246_v61 = vmul.f32 %v2425_v59, %v2639_v41  ;;  %v281_v31 = vadd.f32 %v2439_v1, %v243_v19 }
 0x115   :  { %v893_v2 = vmax.f32 %v861_v15, 0.0  ;;  %v832_v25 = vmul.f32 %v2583_v30, %v723_v8  ;;  %1883 = vmatmul.mubr.bf16.vlgmr.msra.gmra.mrb[0].mxu0 %v939_v33  ;;  %v475_v40 = vadd.f32 %v443_v10, %v279_v3  ;;  %v245_v10 = vmul.f32 %v2425_v59, %v2605_v42 }
 0x116   :  { %v284_v35 = vadd.f32 %v2439_v1, %v246_v61  ;;  %v478_v8 = vadd.f32 %v446_v20, %v282_v49  ;;  %v477_v7 = vadd.f32 %v445_v0, %v281_v31  ;;  %v3192_v61 = vld [vmem:[#allocation5_spill] sm:$0xff]  ;;  %v3193_v31 = vld [vmem:[#allocation4_spill] sm:$0xff] }
 0x117   :  { %v864_v54 = vadd.f32 %v832_v25, %v668_v6  ;;  %406 = vperm.xlu1 %2056, %v2627_v50   ;;  %v547_v16 = vpop.permute.xlu1 %546  ;;  %v940_v5 = vpack.c.bf16 %v894_v21, %v893_v2  ;;  %v671_v43 = vadd.f32 %v639_v29, %v475_v40  ;;  %v3189_v6 = vld [vmem:[#allocation18_spill] sm:$0xff]  ;;  %v447_v25 = vmul.f32 %v2446_v4, %v2683_v18 }
 0x118   :  { %v727_v38 = vpop.permute.xlu0 %726  ;;  %v641_v63 = vmul.f32 %v2578_v13, %v547_v16  ;;  %v283_v42 = vadd.f32 %v2439_v1, %v245_v10 }
 0x119   :  { %v896_v11 = vmax.f32 %v864_v54, 0.0  ;;  %v833_v47 = vmul.f32 %v2583_v30, %v727_v38  ;;  %1886 = vmatprep.mubr.bf16.mxu0 %v940_v5  ;;  %v867_v46 = vadd.f32 %v835_v36, %v671_v43 }
 0x11a   :  { %v673_v3 = vadd.f32 %v641_v63, %v477_v7  ;;  %v479_v18 = vadd.f32 %v447_v25, %v283_v42  ;;  %v3195_v63 = vld [vmem:[#allocation2_spill] sm:$0xff] }
 0x11b   :  { %v865_v57 = vadd.f32 %v833_v47, %v669_v60  ;;  %2057 = vset.pattern.permute.xlu1 %v3179_v58  ;;  %v555_v51 = vpop.permute.xlu1 %554  ;;  %v941_v24 = vpack.c.bf16 %v896_v11, %v895_v32  ;;  %v899_v23 = vmax.f32 %v867_v46, 0.0  ;;  %v480_v32 = vadd.f32 %v448_v53, %v284_v35  ;;  %v63_v46 = vld [vmem:[%s3140_s0 + $0xf0] sm:$0xff] }
 0x11c   :  { %594 = vperm.xlu1 %2057, %v2297_v26   ;;  %v739_v62 = vpop.permute.xlu0 %738  ;;  %v642_v26 = vmul.f32 %v2578_v13, %v3189_v6  ;;  %v643_v9 = vmul.f32 %v2578_v13, %v555_v51  ;;  %v3190_v60 = vmov 3   ;;  %v3196_v6 = vld [vmem:[#allocation10_spill] sm:$0xff] }
 0x11d   :  { %v897_v34 = vmax.f32 %v865_v57, 0.0  ;;  %v836_v56 = vmul.f32 %v2583_v30, %v739_v62  ;;  %1887 = vmatmul.mubr.bf16.gmra.mrb[4].mxu0 %v941_v24  ;;  %v248_v62 = vmul.f32 %v2425_v59, %v3192_v61  ;;  %v2076_v61 = vld [vmem:[%s3144_s5 + $0x10] sm:$0xff]  }
 0x11e   :  { %v674_v5 = vadd.f32 %v642_v26, %v478_v8  ;;  %v675_v38 = vadd.f32 %v643_v9, %v479_v18  ;;  %v449_v26 = vmul.f32 %v2446_v4, %v3196_v6  ;;  %v3197_v8 = vld [vmem:[#allocation11_spill] sm:$0xff] }
 0x11f   :  { %v868_v15 = vadd.f32 %v836_v56, %v672_v48  ;;  %v559_v33 = vpop.permute.xlu1 %558  ;;  %v942_v41 = vpack.c.bf16 %v898_v55, %v897_v34  ;;  %v3191_v55 = vld [vmem:[#allocation3_spill] sm:$0xff]  ;;  %v286_v20 = vadd.f32 %v2439_v1, %v248_v62  ;;  %v452_v7 = vmul.f32 %v2446_v4, %v3197_v8  ;;  %v3200_v8 = vld [vmem:[#allocation12_spill] sm:$0xff] }
 0x120   :  { %602 = vperm.xlu1 %2057, %v2627_v50   ;;  %v743_v22 = vpop.permute.xlu0 %742  ;;  %v644_v39 = vmul.f32 %v2578_v13, %v559_v33  ;;  %v3194_v34 = vld [vmem:[#allocation19_spill] sm:$0xff] }
 0x121   :  { %v900_v21 = vmax.f32 %v868_v15, 0.0  ;;  %v837_v2 = vmul.f32 %v2583_v30, %v743_v22  ;;  %1890 = vmatprep.mubr.bf16.mxu0 %v942_v41 }
 0x122   :  { %v676_v45 = vadd.f32 %v644_v39, %v480_v32 }
 0x123   :  { %v943_v29 = vpack.c.bf16 %v900_v21, %v899_v23  ;;  %v869_v16 = vadd.f32 %v837_v2, %v673_v3 }
 0x124   :  { %606 = vperm.xlu1 %2057, %v2308_v28   ;;  %v747_v17 = vpop.permute.xlu1 %746  ;;  %v755_v54 = vpop.permute.xlu0 %754 }
 0x125   :  { %v838_v40 = vmul.f32 %v2583_v30, %v747_v17  ;;  %v840_v52 = vmul.f32 %v2583_v30, %v755_v54  ;;  %1891 = vmatmul.mubr.bf16.gmra.mrb[8].mxu0 %v943_v29  ;;  %v901_v11 = vmax.f32 %v869_v16, 0.0 }
 0x127   :  { %v870_v36 = vadd.f32 %v838_v40, %v674_v5  ;;  %v872_v43 = vadd.f32 %v840_v52, %v676_v45  ;;  %v2074_v45 = vld [vmem:[%s3144_s5] sm:$0xff]  }
 0x128   :  { %2058 = vset.pattern.permute.xlu1 %v3190_v60  ;;  %v751_v19 = vpop.permute.xlu1 %750  ;;  %v759_v22 = vpop.permute.xlu0 %758  ;;  %1914 = vmatprep.subr.bf16.mxu1 %v2074_v45 }
 0x129   :  { %v902_v47 = vmax.f32 %v870_v36, 0.0  ;;  %v839_v28 = vmul.f32 %v2583_v30, %v751_v19  ;;  %794 = vperm.xlu1 %2058, %v2206_v12   ;;  %v904_v0 = vmax.f32 %v872_v43, 0.0  ;;  %v841_v29 = vmul.f32 %v2583_v30, %v759_v22  ;;  %v2081_v22 = vld [vmem:[%s3144_s5 + $0x38] sm:$0xff]  }
 0x12b   :  { %v871_v27 = vadd.f32 %v839_v28, %v675_v38  ;;  %v944_v49 = vpack.c.bf16 %v902_v47, %v901_v11  ;;  %v2090_v28 = vld [vmem:[%s3140_s0 + $0xe8] sm:$0xff] }
 0x12c   :  { %v771_v9 = vpop.permute.xlu0 %770 }
 0x12d   :  { %v903_v57 = vmax.f32 %v871_v27, 0.0  ;;  %798 = vperm.xlu1 %2058, %v2627_v50   ;;  %v150_v51 = vpop.permute.xlu1 %149  ;;  %1894 = vmatprep.mubr.bf16.mxu0 %v944_v49  ;;  %v844_v40 = vmul.f32 %v2583_v30, %v771_v9 }
 0x12e   :  { %v247_v33 = vmul.f32 %v2425_v59, %v150_v51 }
 0x12f   :  { %v945_v24 = vpack.c.bf16 %v904_v0, %v903_v57 }
 0x130   :  { %v285_v23 = vadd.f32 %v2439_v1, %v247_v33 }
 0x131   :  { %2059 = vset.pattern.permute.xlu1 %v3186_v37  ;;  %v160_v48 = vpop.permute.xlu1 %159  ;;  %1895 = vmatmul.mubr.bf16.gmra.mrb[12].mxu0 %v945_v24  ;;  %v646_v37 = vmul.f32 %v2578_v13, %v3194_v34 }
 0x132   :  { %209 = vperm.xlu1 %2059, %v3191_v55   ;;  %v481_v2 = vadd.f32 %v449_v26, %v285_v23  ;;  %v249_v3 = vmul.f32 %v2425_v59, %v160_v48  ;;  %v2080_v23 = vld [vmem:[%s3144_s5 + $0x30] sm:$0xff]  }
 0x134   :  { %v287_v17 = vadd.f32 %v2439_v1, %v249_v3 }
 0x135   :  { %v165_v12 = vpop.permute.xlu1 %164 }
 0x136   :  { %219 = vperm.xlu1 %2059, %v63_v46   ;;  %v250_v10 = vmul.f32 %v2425_v59, %v165_v12 }
 0x138   :  { %v288_v21 = vadd.f32 %v2439_v1, %v250_v10 }
 0x13a   :  { %224 = vperm.xlu1 %2059, %v3193_v31   ;;  %v371_v50 = vpop.permute.xlu1 %370  ;;  %v484_v32 = vadd.f32 %v452_v7, %v288_v21  ;;  %v453_v7 = vmul.f32 %v2446_v4, %v3200_v8 }
 0x13b   :  { %v450_v56 = vmul.f32 %v2446_v4, %v371_v50  ;;  %v2077_v50 = vld [vmem:[%s3144_s5 + $0x18] sm:$0xff]  }
 0x13d   :  { %v482_v44 = vadd.f32 %v450_v56, %v286_v20 }
 0x13e   :  { %2061 = vset.pattern.permute.xlu1 %v3187_v14  ;;  %v375_v53 = vpop.permute.xlu1 %374 }
 0x13f   :  { %418 = vperm.xlu1 %2061, %v3195_v63   ;;  %v678_v15 = vadd.f32 %v646_v37, %v482_v44  ;;  %v451_v42 = vmul.f32 %v2446_v4, %v375_v53  ;;  %v3199_v37 = vld [vmem:[#allocation20_spill] sm:$0xff]  ;;  %v2078_v53 = vld [vmem:[%s3144_s5 + $0x20] sm:$0xff]  }
 0x140   :  { %v650_v56 = vmul.f32 %v2578_v13, %v3199_v37  ;;  %v3203_v37 = vld [vmem:[#allocation21_spill] sm:$0xff] }
 0x141   :  { %v483_v36 = vadd.f32 %v451_v42, %v287_v17  ;;  %v3201_v42 = vld [vmem:[#allocation13_spill] sm:$0xff] }
 0x142   :  { %v456_v9 = vmul.f32 %v2446_v4, %v3201_v42 }
 0x143   :  { %422 = vperm.xlu1 %2061, %v63_v46   ;;  %v563_v41 = vpop.permute.xlu1 %562 }
 0x144   :  { %v645_v14 = vmul.f32 %v2578_v13, %v563_v41  ;;  %v2079_v41 = vld [vmem:[%s3144_s5 + $0x28] sm:$0xff]  }
 0x146   :  { %v677_v39 = vadd.f32 %v645_v14, %v481_v2  ;;  %v775_v2 = vpop.permute.xlu0 %774 }
 0x147   :  { %2063 = vset.pattern.permute.xlu1 %v3179_v58  ;;  %v571_v35 = vpop.permute.xlu1 %570 }
 0x148   :  { %610 = vperm.xlu1 %2063, %v3191_v55   ;;  %v647_v54 = vmul.f32 %v2578_v13, %v571_v35  ;;  %v873_v18 = vadd.f32 %v841_v29, %v677_v39 }
 0x14a   :  { %v679_v19 = vadd.f32 %v647_v54, %v483_v36  ;;  %v905_v27 = vmax.f32 %v873_v18, 0.0  ;;  %v787_v54 = vpop.permute.xlu0 %786 }
 0x14b   :  { %v575_v25 = vpop.permute.xlu1 %574 }
 0x14c   :  { %618 = vperm.xlu1 %2063, %v63_v46   ;;  %v648_v58 = vmul.f32 %v2578_v13, %v575_v25 }
 0x14e   :  { %v680_v5 = vadd.f32 %v648_v58, %v484_v32  ;;  %v845_v58 = vmul.f32 %v2583_v30, %v775_v2  ;;  %v791_v8 = vpop.permute.xlu0 %790 }
 0x150   :  { %622 = vperm.xlu1 %2063, %v3193_v31   ;;  %v763_v16 = vpop.permute.xlu1 %762  ;;  %v876_v47 = vadd.f32 %v844_v40, %v680_v5  ;;  %v3198_v31 = vld [vmem:[#allocation6_spill] sm:$0xff] }
 0x151   :  { %v842_v52 = vmul.f32 %v2583_v30, %v763_v16 }
 0x152   :  { %v908_v51 = vmax.f32 %v876_v47, 0.0 }
 0x153   :  { %v874_v38 = vadd.f32 %v842_v52, %v678_v15  ;;  %v848_v52 = vmul.f32 %v2583_v30, %v787_v54 }
 0x154   :  { %2065 = vset.pattern.permute.xlu1 %v3190_v60  ;;  %v767_v11 = vpop.permute.xlu1 %766  ;;  %v2075_v60 = vld [vmem:[%s3144_s5 + $0x8] sm:$0xff]  }
 0x155   :  { %v843_v43 = vmul.f32 %v2583_v30, %v767_v11  ;;  %810 = vperm.xlu1 %2065, %v2090_v28   ;;  %v906_v49 = vmax.f32 %v874_v38, 0.0 }
 0x157   :  { %v875_v0 = vadd.f32 %v843_v43, %v679_v19  ;;  %v946_v57 = vpack.c.bf16 %v906_v49, %v905_v27 }
 0x159   :  { %v907_v24 = vmax.f32 %v875_v0, 0.0  ;;  %814 = vperm.xlu1 %2065, %v63_v46   ;;  %v170_v48 = vpop.permute.xlu1 %169  ;;  %1898 = vmatprep.mubr.bf16.mxu1 %v946_v57  ;;  %v252_v46 = vmul.f32 %v2425_v59, %v3198_v31  ;;  %v3202_v31 = vld [vmem:[#allocation7_spill] sm:$0xff] }
 0x15a   :  { %v251_v6 = vmul.f32 %v2425_v59, %v170_v48 }
 0x15b   :  { %v947_v55 = vpack.c.bf16 %v908_v51, %v907_v24  ;;  %v290_v34 = vadd.f32 %v2439_v1, %v252_v46  ;;  %v256_v46 = vmul.f32 %v2425_v59, %v3202_v31  ;;  %v3207_v31 = vld [vmem:[#allocation22_spill] sm:$0xff] }
 0x15c   :  { %v289_v10 = vadd.f32 %v2439_v1, %v251_v6 }
 0x15d   :  { %v180_v12 = vpop.permute.xlu1 %179  ;;  %1899 = vmatmul.mubr.bf16.vlgmr.msra.gmra.mrb[0].mxu1 %v947_v55 }
 0x15e   :  { %1915 = vmatpush3.bf16.msra.mxu1 %v2074_v45  ;;  %v485_v25 = vadd.f32 %v453_v7, %v289_v10  ;;  %v253_v32 = vmul.f32 %v2425_v59, %v180_v12 }
 0x15f   :  { %1916 = vmatprep.subr.bf16.mxu1 %v2075_v60 }
 0x160   :  { %v291_v45 = vadd.f32 %v2439_v1, %v253_v32 }
 0x161   :  { %v185_v62 = vpop.permute.xlu1 %184 }
 0x162   :  { %1917 = vmatpush3.bf16.msra.mxu1 %v2075_v60  ;;  %v254_v35 = vmul.f32 %v2425_v59, %v185_v62 }
 0x163   :  { %1918 = vmatprep.subr.bf16.mxu1 %v2076_v61 }
 0x164   :  { %v292_v3 = vadd.f32 %v2439_v1, %v254_v35 }
 0x166   :  { %v387_v20 = vpop.permute.xlu1 %386  ;;  %1919 = vmatpush3.bf16.msra.mxu1 %v2076_v61  ;;  %v488_v5 = vadd.f32 %v456_v9, %v292_v3 }
 0x167   :  { %v454_v44 = vmul.f32 %v2446_v4, %v387_v20  ;;  %1920 = vmatprep.subr.bf16.mxu1 %v2077_v50  ;;  %v294_v20 = vadd.f32 %v2439_v1, %v256_v46  ;;  %v658_v46 = vmul.f32 %v2578_v13, %v3207_v31 }
 0x169   :  { %v486_v63 = vadd.f32 %v454_v44, %v290_v34 }
 0x16a   :  { %v391_v15 = vpop.permute.xlu1 %390  ;;  %1921 = vmatpush3.bf16.msra.mxu1 %v2077_v50 }
 0x16b   :  { %v682_v33 = vadd.f32 %v650_v56, %v486_v63  ;;  %1922 = vmatprep.subr.bf16.mxu1 %v2078_v53  ;;  %v455_v16 = vmul.f32 %v2446_v4, %v391_v15  ;;  %v654_v56 = vmul.f32 %v2578_v13, %v3203_v37 }
 0x16d   :  { %v487_v11 = vadd.f32 %v455_v16, %v291_v45 }
 0x16e   :  { %1923 = vmatpush3.bf16.msra.mxu1 %v2078_v53 }
 0x16f   :  { %v579_v26 = vpop.permute.xlu1 %578  ;;  %1924 = vmatprep.subr.bf16.mxu1 %v2079_v41 }
 0x170   :  { %v649_v21 = vmul.f32 %v2578_v13, %v579_v26 }
 0x172   :  { %1925 = vmatpush3.bf16.msra.mxu1 %v2079_v41  ;;  %v681_v29 = vadd.f32 %v649_v21, %v485_v25  ;;  %v849_v21 = vmul.f32 %v2583_v30, %v791_v8  ;;  %v3205_v25 = vld [vmem:[#allocation15_spill] sm:$0xff] }
 0x173   :  { %v587_v14 = vpop.permute.xlu1 %586  ;;  %1926 = vmatprep.subr.bf16.mxu1 %v2080_v23  ;;  %v460_v3 = vmul.f32 %v2446_v4, %v3205_v25 }
 0x174   :  { %v877_v40 = vadd.f32 %v845_v58, %v681_v29  ;;  %v651_v36 = vmul.f32 %v2578_v13, %v587_v14 }
 0x176   :  { %1927 = vmatpush3.bf16.msra.mxu1 %v2080_v23  ;;  %v909_v43 = vmax.f32 %v877_v40, 0.0  ;;  %v683_v27 = vadd.f32 %v651_v36, %v487_v11  ;;  %v3204_v23 = vld [vmem:[#allocation14_spill] sm:$0xff]  ;;  %v803_v40 = vpop.permute.xlu0 %802 }
 0x177   :  { %v591_v39 = vpop.permute.xlu1 %590  ;;  %1928 = vmatprep.subr.bf16.mxu1 %v2081_v22  ;;  %v457_v10 = vmul.f32 %v2446_v4, %v3204_v23  ;;  %v2091_v23 = vld [vmem:[%s3143_s2] ss:$0 sm:$0xff] }
 0x178   :  { %v652_v17 = vmul.f32 %v2578_v13, %v591_v39 }
 0x17a   :  { %1929 = vmatpush3.bf16.msra.mxu1 %v2081_v22  ;;  %v684_v38 = vadd.f32 %v652_v17, %v488_v5 }
 0x17c   :  { %v779_v18 = vpop.permute.xlu1 %778  ;;  %v880_v49 = vadd.f32 %v848_v52, %v684_v38  ;;  %v852_v52 = vmul.f32 %v2583_v30, %v803_v40 }
 0x17d   :  { %v846_v19 = vmul.f32 %v2583_v30, %v779_v18 }
 0x17e   :  { %v912_v48 = vmax.f32 %v880_v49, 0.0 }
 0x17f   :  { %v878_v47 = vadd.f32 %v846_v19, %v682_v33 }
 0x180   :  { %v783_v28 = vpop.permute.xlu1 %782 }
 0x181   :  { %v910_v0 = vmax.f32 %v878_v47, 0.0  ;;  %v847_v57 = vmul.f32 %v2583_v30, %v783_v28 }
 0x183   :  { %v879_v51 = vadd.f32 %v847_v57, %v683_v27  ;;  %v948_v24 = vpack.c.bf16 %v910_v0, %v909_v43 }
 0x185   :  { %v911_v55 = vmax.f32 %v879_v51, 0.0  ;;  %v190_v60 = vpop.permute.xlu1 %189  ;;  %1902 = vmatprep.mubr.bf16.mxu1 %v948_v24 }
 0x186   :  { %v255_v15 = vmul.f32 %v2425_v59, %v190_v60 }
 0x187   :  { %v949_v12 = vpack.c.bf16 %v912_v48, %v911_v55  ;;  %v3206_v55 = vld [vmem:[#allocation8_spill] sm:$0xff] }
 0x188   :  { %v293_v41 = vadd.f32 %v2439_v1, %v255_v15  ;;  %v260_v60 = vmul.f32 %v2425_v59, %v3206_v55  ;;  %v3208_v15 = vld [vmem:[#allocation16_spill] sm:$0xff] }
 0x189   :  { %v200_v61 = vpop.permute.xlu1 %199  ;;  %1903 = vmatmul.mubr.bf16.gmra.mrb[4].mxu1 %v949_v12 }
 0x18a   :  { %v489_v14 = vadd.f32 %v457_v10, %v293_v41  ;;  %v257_v39 = vmul.f32 %v2425_v59, %v200_v61  ;;  %v298_v61 = vadd.f32 %v2439_v1, %v260_v60 }
 0x18c   :  { %v295_v17 = vadd.f32 %v2439_v1, %v257_v39 }
 0x18d   :  { %v205_v62 = vpop.permute.xlu1 %204 }
 0x18e   :  { %v258_v6 = vmul.f32 %v2425_v59, %v205_v62 }
 0x190   :  { %v296_v22 = vadd.f32 %v2439_v1, %v258_v6  ;;  %v807_v6 = vpop.permute.xlu0 %806 }
 0x192   :  { %v403_v50 = vpop.permute.xlu1 %402  ;;  %v492_v42 = vadd.f32 %v460_v3, %v296_v22  ;;  %v3209_v22 = vld [vmem:[#allocation17_spill] sm:$0xff] }
 0x193   :  { %v458_v34 = vmul.f32 %v2446_v4, %v403_v50 }
 0x194   :  { %v819_v3 = vpop.permute.xlu0 %818 }
 0x195   :  { %v490_v44 = vadd.f32 %v458_v34, %v294_v20 }
 0x196   :  { %v407_v53 = vpop.permute.xlu1 %406 }
 0x197   :  { %v686_v63 = vadd.f32 %v654_v56, %v490_v44  ;;  %v459_v58 = vmul.f32 %v2446_v4, %v407_v53 }
 0x199   :  { %v491_v18 = vadd.f32 %v459_v58, %v295_v17  ;;  %v856_v17 = vmul.f32 %v2583_v30, %v819_v3 }
 0x19b   :  { %v595_v33 = vpop.permute.xlu1 %594 }
 0x19c   :  { %v653_v35 = vmul.f32 %v2578_v13, %v595_v33  ;;  %v461_v33 = vmul.f32 %v2446_v4, %v3208_v15 }
 0x19e   :  { %v685_v2 = vadd.f32 %v653_v35, %v489_v14 }
 0x19f   :  { %v603_v26 = vpop.permute.xlu1 %602 }
 0x1a0   :  { %v881_v9 = vadd.f32 %v849_v21, %v685_v2  ;;  %v655_v54 = vmul.f32 %v2578_v13, %v603_v26  ;;  %v853_v21 = vmul.f32 %v2583_v30, %v807_v6 }
 0x1a2   :  { %v913_v36 = vmax.f32 %v881_v9, 0.0  ;;  %v687_v19 = vadd.f32 %v655_v54, %v491_v18 }
 0x1a3   :  { %v607_v7 = vpop.permute.xlu1 %606 }
 0x1a4   :  { %v656_v29 = vmul.f32 %v2578_v13, %v607_v7 }
 0x1a6   :  { %v688_v16 = vadd.f32 %v656_v29, %v492_v42 }
 0x1a8   :  { %v795_v32 = vpop.permute.xlu1 %794  ;;  %v884_v11 = vadd.f32 %v852_v52, %v688_v16 }
 0x1a9   :  { %v850_v5 = vmul.f32 %v2583_v30, %v795_v32 }
 0x1aa   :  { %v916_v49 = vmax.f32 %v884_v11, 0.0  ;;  %v2880_v11 = vld [vmem:[%s3145_s4] ss:$0 sm:$0xff] }
 0x1ab   :  { %v882_v45 = vadd.f32 %v850_v5, %v686_v63 }
 0x1ac   :  { %v799_v38 = vpop.permute.xlu1 %798 }
 0x1ad   :  { %v914_v47 = vmax.f32 %v882_v45, 0.0  ;;  %v851_v43 = vmul.f32 %v2583_v30, %v799_v38 }
 0x1af   :  { %v883_v28 = vadd.f32 %v851_v43, %v687_v19  ;;  %v950_v27 = vpack.c.bf16 %v914_v47, %v913_v36 }
 0x1b1   :  { %v915_v0 = vmax.f32 %v883_v28, 0.0  ;;  %v210_v57 = vpop.permute.xlu1 %209  ;;  %1906 = vmatprep.mubr.bf16.mxu1 %v950_v27 }
 0x1b2   :  { %v259_v37 = vmul.f32 %v2425_v59, %v210_v57 }
 0x1b3   :  { %v951_v51 = vpack.c.bf16 %v916_v49, %v915_v0 }
 0x1b4   :  { %v297_v44 = vadd.f32 %v2439_v1, %v259_v37  ;;  %v464_v1 = vmul.f32 %v2446_v4, %v3209_v22 }
 0x1b5   :  { %v220_v24 = vpop.permute.xlu1 %219  ;;  %1907 = vmatmul.mubr.bf16.gmra.mrb[8].mxu1 %v951_v51 }
 0x1b6   :  { %v493_v26 = vadd.f32 %v461_v33, %v297_v44  ;;  %v261_v8 = vmul.f32 %v2425_v59, %v220_v24 }
 0x1b8   :  { %v299_v58 = vadd.f32 %v2091_v23, %v261_v8 }
 0x1b9   :  { %v225_v48 = vpop.permute.xlu1 %224 }
 0x1ba   :  { %v262_v53 = vmul.f32 %v2425_v59, %v225_v48 }
 0x1bc   :  { %v300_v10 = vadd.f32 %v2091_v23, %v262_v53 }
 0x1be   :  { %v419_v12 = vpop.permute.xlu1 %418  ;;  %v496_v25 = vadd.f32 %v464_v1, %v300_v10 }
 0x1bf   :  { %v462_v62 = vmul.f32 %v2446_v4, %v419_v12 }
 0x1c1   :  { %v494_v50 = vadd.f32 %v462_v62, %v298_v61 }
 0x1c2   :  { %v423_v20 = vpop.permute.xlu1 %422 }
 0x1c3   :  { %v690_v34 = vadd.f32 %v658_v46, %v494_v50  ;;  %v463_v2 = vmul.f32 %v2446_v4, %v423_v20 }
 0x1c5   :  { %v495_v54 = vadd.f32 %v463_v2, %v299_v58 }
 0x1c7   :  { %v611_v56 = vpop.permute.xlu1 %610 }
 0x1c8   :  { %v657_v41 = vmul.f32 %v2578_v13, %v611_v56 }
 0x1ca   :  { %v689_v14 = vadd.f32 %v657_v41, %v493_v26 }
 0x1cb   :  { %v619_v63 = vpop.permute.xlu1 %618 }
 0x1cc   :  { %v885_v39 = vadd.f32 %v853_v21, %v689_v14  ;;  %v659_v42 = vmul.f32 %v2578_v13, %v619_v63 }
 0x1ce   :  { %v917_v16 = vmax.f32 %v885_v39, 0.0  ;;  %v691_v40 = vadd.f32 %v659_v42, %v495_v54 }
 0x1cf   :  { %v623_v35 = vpop.permute.xlu1 %622 }
 0x1d0   :  { %v660_v7 = vmul.f32 %v2578_v13, %v623_v35 }
 0x1d2   :  { %v692_v9 = vadd.f32 %v660_v7, %v496_v25 }
 0x1d4   :  { %v811_v29 = vpop.permute.xlu1 %810  ;;  %v888_v52 = vadd.f32 %v856_v17, %v692_v9 }
 0x1d5   :  { %v854_v32 = vmul.f32 %v2583_v30, %v811_v29 }
 0x1d6   :  { %v920_v38 = vmax.f32 %v888_v52, 0.0 }
 0x1d7   :  { %v886_v59 = vadd.f32 %v854_v32, %v690_v34 }
 0x1d8   :  { %v815_v5 = vpop.permute.xlu1 %814 }
 0x1d9   :  { %v918_v18 = vmax.f32 %v886_v59, 0.0  ;;  %v855_v4 = vmul.f32 %v2583_v30, %v815_v5 }
 0x1db   :  { %v887_v45 = vadd.f32 %v855_v4, %v691_v40  ;;  %v952_v36 = vpack.c.bf16 %v918_v18, %v917_v16  ;;  %v2082_v18 = vld [vmem:[%s3146_s7] sm:$0xff]  }
 0x1dc   :  { %1962 = vmatprep.subr.bf16.mxu0 %v2082_v18 }
 0x1dd   :  { %v919_v19 = vmax.f32 %v887_v45, 0.0  ;;  %1910 = vmatprep.mubr.bf16.mxu1 %v952_v36  ;;  %1963 = vmatpush3.bf16.msra.mxu0 %v2082_v18 }
 0x1df   :  { %v953_v13 = vpack.c.bf16 %v920_v38, %v919_v19 }
 0x1e1   :  { %1911 = vmatmul.mubr.bf16.gmra.mrb[12].mxu1 %v953_v13 }
 0x1e8   :  { %v1884_v47 = vpop.f32.mrb[0].mxu0 }
 0x1e9   :  { %v1051_v43 = vadd.f32 %v1884_v47, %v2880_v11  ;;  %v1042_v28 = vpop.f32.mrb[1].mxu0 }
 0x1ea   :  { %v1043_v27 = vadd.f32 %v2880_v11, %v1042_v28  ;;  %v1885_v49 = vpop.f32.mrb[2].mxu0 }
 0x1eb   :  { %v1054_v30 = vadd.f32 %v1885_v49, %v2880_v11  ;;  %v1045_v0 = vpop.f32.mrb[3].mxu0  ;;  %v1171_v51 = vmax.f32 %v1051_v43, 0.0  ;;  %v2083_v43 = vld [vmem:[%s3146_s7 + $0x8] sm:$0xff]  }
 0x1ec   :  { %v1046_v57 = vadd.f32 %v2880_v11, %v1045_v0  ;;  %v1169_v48 = vmax.f32 %v1043_v27, 0.0  ;;  %1964 = vmatprep.subr.bf16.mxu0 %v2083_v43 }
 0x1ed   :  { %v1172_v24 = vmax.f32 %v1054_v30, 0.0  ;;  %1965 = vmatpush3.bf16.msra.mxu0 %v2083_v43 }
 0x1ee   :  { %v1170_v55 = vmax.f32 %v1046_v57, 0.0 }
 0x1ef   :  { %v1219_v60 = vpack.c.bf16 %v1172_v24, %v1171_v51  ;;  %v2084_v51 = vld [vmem:[%s3146_s7 + $0x10] sm:$0xff]  }
 0x1f0   :  { %v1218_v12 = vpack.c.bf16 %v1170_v55, %v1169_v48  ;;  %v1888_v61 = vpop.f32.mrb[4].mxu0  ;;  %1966 = vmatprep.subr.bf16.mxu0 %v2084_v51  ;;  %v2085_v48 = vld [vmem:[%s3146_s7 + $0x18] sm:$0xff]   ;;  %v2086_v55 = vld [vmem:[%s3146_s7 + $0x20] sm:$0xff]  }
 0x1f1   :  { %v1067_v62 = vadd.f32 %v1888_v61, %v2880_v11  ;;  %v1058_v31 = vpop.f32.mrb[5].mxu0  ;;  %1967 = vmatpush3.bf16.msra.mxu0 %v2084_v51  ;;  %v2089_v61 = vld [vmem:[%s3146_s7 + $0x38] sm:$0xff]  }
 0x1f2   :  { %v1059_v46 = vadd.f32 %v2880_v11, %v1058_v31  ;;  %v1889_v50 = vpop.f32.mrb[6].mxu0  ;;  %1930 = vmatprep.mubr.bf16.mxu1 %v1218_v12  ;;  %1968 = vmatprep.subr.bf16.mxu0 %v2085_v48  ;;  %v2088_v12 = vld [vmem:[%s3146_s7 + $0x30] sm:$0xff]  }
 0x1f3   :  { %v1070_v20 = vadd.f32 %v1889_v50, %v2880_v11  ;;  %v1061_v34 = vpop.f32.mrb[7].mxu0  ;;  %1931 = vmatmul.mubr.bf16.vlgmr.msra.gmra.mrb[16].mxu1 %v1219_v60  ;;  %v1175_v56 = vmax.f32 %v1067_v62, 0.0  ;;  %v2087_v60 = vld [vmem:[%s3146_s7 + $0x28] sm:$0xff]  }
 0x1f4   :  { %v1062_v37 = vadd.f32 %v2880_v11, %v1061_v34  ;;  %v1173_v53 = vmax.f32 %v1059_v46, 0.0 }
 0x1f5   :  { %v1176_v44 = vmax.f32 %v1070_v20, 0.0  ;;  %1969 = vmatpush3.bf16.msra.mxu0 %v2085_v48 }
 0x1f6   :  { %v1174_v63 = vmax.f32 %v1062_v37, 0.0  ;;  %1970 = vmatprep.subr.bf16.mxu0 %v2086_v55 }
 0x1f7   :  { %v1221_v15 = vpack.c.bf16 %v1176_v44, %v1175_v56 }
 0x1f8   :  { %v1220_v33 = vpack.c.bf16 %v1174_v63, %v1173_v53  ;;  %v1892_v41 = vpop.f32.mrb[8].mxu0 }
 0x1f9   :  { %v1083_v6 = vadd.f32 %v1892_v41, %v2880_v11  ;;  %v1074_v26 = vpop.f32.mrb[9].mxu0  ;;  %1971 = vmatpush3.bf16.msra.mxu0 %v2086_v55 }
 0x1fa   :  { %v1075_v23 = vadd.f32 %v2880_v11, %v1074_v26  ;;  %v1893_v10 = vpop.f32.mrb[10].mxu0  ;;  %1934 = vmatprep.mubr.bf16.mxu1 %v1220_v33  ;;  %1972 = vmatprep.subr.bf16.mxu0 %v2087_v60 }
 0x1fb   :  { %v1086_v35 = vadd.f32 %v1893_v10, %v2880_v11  ;;  %v1077_v14 = vpop.f32.mrb[11].mxu0  ;;  %1935 = vmatmul.mubr.bf16.gmra.mrb[20].mxu1 %v1221_v15  ;;  %v1179_v1 = vmax.f32 %v1083_v6, 0.0 }
 0x1fc   :  { %v1078_v22 = vadd.f32 %v2880_v11, %v1077_v14  ;;  %v1177_v7 = vmax.f32 %v1075_v23, 0.0 }
 0x1fd   :  { %v1180_v8 = vmax.f32 %v1086_v35, 0.0  ;;  %1973 = vmatpush3.bf16.msra.mxu0 %v2087_v60 }
 0x1fe   :  { %v1178_v21 = vmax.f32 %v1078_v22, 0.0  ;;  %1974 = vmatprep.subr.bf16.mxu0 %v2088_v12 }
 0x1ff   :  { %v1223_v2 = vpack.c.bf16 %v1180_v8, %v1179_v1 }
 0x200   :  { %v1222_v25 = vpack.c.bf16 %v1178_v21, %v1177_v7 }
 0x201   :  { %1975 = vmatpush3.bf16.msra.mxu0 %v2088_v12 }
 0x202   :  { %1938 = vmatprep.mubr.bf16.mxu1 %v1222_v25  ;;  %1976 = vmatprep.subr.bf16.mxu0 %v2089_v61 }
 0x203   :  { %1939 = vmatmul.mubr.bf16.gmra.mrb[24].mxu1 %v1223_v2 }
 0x204   :  { %v1896_v3 = vpop.f32.mrb[12].mxu0 }
 0x205   :  { %v1099_v39 = vadd.f32 %v1896_v3, %v2880_v11  ;;  %v1090_v29 = vpop.f32.mrb[13].mxu0  ;;  %1977 = vmatpush3.bf16.msra.mxu0 %v2089_v61 }
 0x206   :  { %v1091_v58 = vadd.f32 %v2880_v11, %v1090_v29  ;;  %v1897_v42 = vpop.f32.mrb[14].mxu0 }
 0x207   :  { %v1102_v9 = vadd.f32 %v1897_v42, %v2880_v11  ;;  %v1093_v32 = vpop.f32.mrb[15].mxu0  ;;  %v1183_v54 = vmax.f32 %v1099_v39, 0.0 }
 0x208   :  { %v1094_v17 = vadd.f32 %v2880_v11, %v1093_v32  ;;  %v1181_v16 = vmax.f32 %v1091_v58, 0.0 }
 0x209   :  { %v1184_v59 = vmax.f32 %v1102_v9, 0.0 }
 0x20a   :  { %v1182_v5 = vmax.f32 %v1094_v17, 0.0 }
 0x20b   :  { %v1225_v40 = vpack.c.bf16 %v1184_v59, %v1183_v54 }
 0x20c   :  { %v1224_v52 = vpack.c.bf16 %v1182_v5, %v1181_v16 }
 0x20e   :  { %1942 = vmatprep.mubr.bf16.mxu1 %v1224_v52 }
 0x20f   :  { %1943 = vmatmul.mubr.bf16.gmra.mrb[28].mxu1 %v1225_v40 }
 0x230   :  { %v1900_v4 = vpop.f32.mrb[0].mxu1 }
 0x231   :  { %v1115_v45 = vadd.f32 %v1900_v4, %v2880_v11  ;;  %v1106_v36 = vpop.f32.mrb[1].mxu1  ;;  %v2941_v4 = vld [vmem:[%s3147_s6] ss:$0 sm:$0xff] }
 0x232   :  { %v1107_v38 = vadd.f32 %v2880_v11, %v1106_v36  ;;  %v1901_v19 = vpop.f32.mrb[2].mxu1 }
 0x233   :  { %v1118_v13 = vadd.f32 %v1901_v19, %v2880_v11  ;;  %v1109_v47 = vpop.f32.mrb[3].mxu1  ;;  %v1187_v27 = vmax.f32 %v1115_v45, 0.0 }
 0x234   :  { %v1110_v28 = vadd.f32 %v2880_v11, %v1109_v47  ;;  %v1185_v30 = vmax.f32 %v1107_v38, 0.0 }
 0x235   :  { %v1188_v49 = vmax.f32 %v1118_v13, 0.0 }
 0x236   :  { %v1186_v0 = vmax.f32 %v1110_v28, 0.0 }
 0x237   :  { %v1227_v57 = vpack.c.bf16 %v1188_v49, %v1187_v27 }
 0x238   :  { %v1226_v24 = vpack.c.bf16 %v1186_v0, %v1185_v30 }
 0x23a   :  { %1946 = vmatprep.mubr.bf16.mxu1 %v1226_v24 }
 0x23b   :  { %1947 = vmatmul.mubr.bf16.gmra.mrb[32].mxu1 %v1227_v57 }
 0x25c   :  { %v1904_v62 = vpop.f32.mrb[4].mxu1 }
 0x25d   :  { %v1131_v31 = vadd.f32 %v1904_v62, %v2880_v11  ;;  %v1122_v46 = vpop.f32.mrb[5].mxu1 }
 0x25e   :  { %v1123_v50 = vadd.f32 %v2880_v11, %v1122_v46  ;;  %v1905_v20 = vpop.f32.mrb[6].mxu1 }
 0x25f   :  { %v1134_v34 = vadd.f32 %v1905_v20, %v2880_v11  ;;  %v1125_v37 = vpop.f32.mrb[7].mxu1  ;;  %v1191_v44 = vmax.f32 %v1131_v31, 0.0 }
 0x260   :  { %v1126_v56 = vadd.f32 %v2880_v11, %v1125_v37  ;;  %v1189_v63 = vmax.f32 %v1123_v50, 0.0 }
 0x261   :  { %v1192_v53 = vmax.f32 %v1134_v34, 0.0 }
 0x262   :  { %v1190_v15 = vmax.f32 %v1126_v56, 0.0 }
 0x263   :  { %v1229_v33 = vpack.c.bf16 %v1192_v53, %v1191_v44 }
 0x264   :  { %v1228_v41 = vpack.c.bf16 %v1190_v15, %v1189_v63 }
 0x266   :  { %1950 = vmatprep.mubr.bf16.mxu1 %v1228_v41 }
 0x267   :  { %1951 = vmatmul.mubr.bf16.gmra.mrb[36].mxu1 %v1229_v33 }
 0x288   :  { %v1908_v6 = vpop.f32.mrb[8].mxu1 }
 0x289   :  { %v1147_v26 = vadd.f32 %v1908_v6, %v2880_v11  ;;  %v1138_v23 = vpop.f32.mrb[9].mxu1 }
 0x28a   :  { %v1139_v10 = vadd.f32 %v2880_v11, %v1138_v23  ;;  %v1909_v35 = vpop.f32.mrb[10].mxu1 }
 0x28b   :  { %v1150_v14 = vadd.f32 %v1909_v35, %v2880_v11  ;;  %v1141_v22 = vpop.f32.mrb[11].mxu1  ;;  %v1195_v8 = vmax.f32 %v1147_v26, 0.0 }
 0x28c   :  { %v1142_v1 = vadd.f32 %v2880_v11, %v1141_v22  ;;  %v1193_v21 = vmax.f32 %v1139_v10, 0.0 }
 0x28d   :  { %v1196_v7 = vmax.f32 %v1150_v14, 0.0 }
 0x28e   :  { %v1194_v2 = vmax.f32 %v1142_v1, 0.0 }
 0x28f   :  { %v1231_v25 = vpack.c.bf16 %v1196_v7, %v1195_v8 }
 0x290   :  { %v1230_v3 = vpack.c.bf16 %v1194_v2, %v1193_v21 }
 0x292   :  { %1954 = vmatprep.mubr.bf16.mxu1 %v1230_v3 }
 0x293   :  { %1955 = vmatmul.mubr.bf16.gmra.mrb[40].mxu1 %v1231_v25 }
 0x2b4   :  { %v1912_v39 = vpop.f32.mrb[12].mxu1 }
 0x2b5   :  { %v1163_v29 = vadd.f32 %v1912_v39, %v2880_v11  ;;  %v1154_v58 = vpop.f32.mrb[13].mxu1 }
 0x2b6   :  { %v1155_v42 = vadd.f32 %v2880_v11, %v1154_v58  ;;  %v1913_v9 = vpop.f32.mrb[14].mxu1 }
 0x2b7   :  { %v1166_v32 = vadd.f32 %v1913_v9, %v2880_v11  ;;  %v1157_v17 = vpop.f32.mrb[15].mxu1  ;;  %v1199_v59 = vmax.f32 %v1163_v29, 0.0 }
 0x2b8   :  { %v1158_v54 = vadd.f32 %v2880_v11, %v1157_v17  ;;  %v1197_v5 = vmax.f32 %v1155_v42, 0.0 }
 0x2b9   :  { %v1200_v16 = vmax.f32 %v1166_v32, 0.0 }
 0x2ba   :  { %v1198_v40 = vmax.f32 %v1158_v54, 0.0 }
 0x2bb   :  { %v1233_v52 = vpack.c.bf16 %v1200_v16, %v1199_v59 }
 0x2bc   :  { %v1232_v18 = vpack.c.bf16 %v1198_v40, %v1197_v5 }
 0x2be   :  { %1958 = vmatprep.mubr.bf16.mxu1 %v1232_v18 }
 0x2bf   :  { %1959 = vmatmul.mubr.bf16.gmra.mrb[44].mxu1 %v1233_v52 }
 0x2c6   :  { %v1932_v45 = vpop.f32.mrb[16].mxu1 }
 0x2c7   :  { %v1331_v36 = vadd.f32 %v1932_v45, %v2941_v4  ;;  %v1322_v38 = vpop.f32.mrb[17].mxu1 }
 0x2c8   :  { %v1323_v19 = vadd.f32 %v2941_v4, %v1322_v38  ;;  %v1933_v11 = vpop.f32.mrb[18].mxu1 }
 0x2c9   :  { %v1334_v13 = vadd.f32 %v1933_v11, %v2941_v4  ;;  %v1325_v47 = vpop.f32.mrb[19].mxu1  ;;  %v1451_v28 = vmax.f32 %v1331_v36, 0.0 }
 0x2ca   :  { %v1326_v43 = vadd.f32 %v2941_v4, %v1325_v47  ;;  %v1449_v49 = vmax.f32 %v1323_v19, 0.0 }
 0x2cb   :  { %v1452_v27 = vmax.f32 %v1334_v13, 0.0 }
 0x2cc   :  { %v1450_v30 = vmax.f32 %v1326_v43, 0.0 }
 0x2cd   :  { %v1499_v0 = vpack.c.bf16 %v1452_v27, %v1451_v28 }
 0x2ce   :  { %v1498_v57 = vpack.c.bf16 %v1450_v30, %v1449_v49  ;;  %v1936_v51 = vpop.f32.mrb[20].mxu1 }
 0x2cf   :  { %v1347_v24 = vadd.f32 %v1936_v51, %v2941_v4  ;;  %v1338_v48 = vpop.f32.mrb[21].mxu1 }
 0x2d0   :  { %v1339_v55 = vadd.f32 %v2941_v4, %v1338_v48  ;;  %v1937_v60 = vpop.f32.mrb[22].mxu1  ;;  %1978 = vmatprep.mubr.bf16.mxu0 %v1498_v57 }
 0x2d1   :  { %v1350_v12 = vadd.f32 %v1937_v60, %v2941_v4  ;;  %v1341_v61 = vpop.f32.mrb[23].mxu1  ;;  %1979 = vmatmul.mubr.bf16.vlgmr.msra.gmra.mrb[16].mxu0 %v1499_v0  ;;  %v1455_v31 = vmax.f32 %v1347_v24, 0.0 }
 0x2d2   :  { %v1342_v62 = vadd.f32 %v2941_v4, %v1341_v61  ;;  %v1453_v50 = vmax.f32 %v1339_v55, 0.0 }
 0x2d3   :  { %v1456_v46 = vmax.f32 %v1350_v12, 0.0 }
 0x2d4   :  { %v1454_v20 = vmax.f32 %v1342_v62, 0.0 }
 0x2d5   :  { %v1501_v34 = vpack.c.bf16 %v1456_v46, %v1455_v31 }
 0x2d6   :  { %v1500_v37 = vpack.c.bf16 %v1454_v20, %v1453_v50  ;;  %v1940_v56 = vpop.f32.mrb[24].mxu1 }
 0x2d7   :  { %v1363_v44 = vadd.f32 %v1940_v56, %v2941_v4  ;;  %v1354_v53 = vpop.f32.mrb[25].mxu1 }
 0x2d8   :  { %v1355_v63 = vadd.f32 %v2941_v4, %v1354_v53  ;;  %v1941_v15 = vpop.f32.mrb[26].mxu1  ;;  %1982 = vmatprep.mubr.bf16.mxu0 %v1500_v37 }
 0x2d9   :  { %v1366_v33 = vadd.f32 %v1941_v15, %v2941_v4  ;;  %v1357_v41 = vpop.f32.mrb[27].mxu1  ;;  %1983 = vmatmul.mubr.bf16.gmra.mrb[20].mxu0 %v1501_v34  ;;  %v1459_v26 = vmax.f32 %v1363_v44, 0.0 }
 0x2da   :  { %v1358_v6 = vadd.f32 %v2941_v4, %v1357_v41  ;;  %v1457_v10 = vmax.f32 %v1355_v63, 0.0 }
 0x2db   :  { %v1460_v23 = vmax.f32 %v1366_v33, 0.0 }
 0x2dc   :  { %v1458_v35 = vmax.f32 %v1358_v6, 0.0 }
 0x2dd   :  { %v1503_v14 = vpack.c.bf16 %v1460_v23, %v1459_v26 }
 0x2de   :  { %v1502_v22 = vpack.c.bf16 %v1458_v35, %v1457_v10 }
 0x2e0   :  { %1986 = vmatprep.mubr.bf16.mxu0 %v1502_v22 }
 0x2e1   :  { %1987 = vmatmul.mubr.bf16.gmra.mrb[24].mxu0 %v1503_v14 }
 0x2e2   :  { %v1944_v1 = vpop.f32.mrb[28].mxu1 }
 0x2e3   :  { %v1379_v8 = vadd.f32 %v1944_v1, %v2941_v4  ;;  %v1370_v7 = vpop.f32.mrb[29].mxu1 }
 0x2e4   :  { %v1371_v21 = vadd.f32 %v2941_v4, %v1370_v7  ;;  %v1945_v2 = vpop.f32.mrb[30].mxu1 }
 0x2e5   :  { %v1382_v25 = vadd.f32 %v1945_v2, %v2941_v4  ;;  %v1373_v3 = vpop.f32.mrb[31].mxu1  ;;  %v1463_v29 = vmax.f32 %v1379_v8, 0.0 }
 0x2e6   :  { %v1374_v39 = vadd.f32 %v2941_v4, %v1373_v3  ;;  %v1461_v42 = vmax.f32 %v1371_v21, 0.0 }
 0x2e7   :  { %v1464_v58 = vmax.f32 %v1382_v25, 0.0 }
 0x2e8   :  { %v1462_v9 = vmax.f32 %v1374_v39, 0.0  ;;  %v2978_v39 = vld [vmem:[%s3148_s8] ss:$0 sm:$0xff] }
 0x2e9   :  { %v1505_v32 = vpack.c.bf16 %v1464_v58, %v1463_v29 }
 0x2ea   :  { %v1504_v17 = vpack.c.bf16 %v1462_v9, %v1461_v42 }
 0x2ec   :  { %1990 = vmatprep.mubr.bf16.mxu0 %v1504_v17 }
 0x2ed   :  { %1991 = vmatmul.mubr.bf16.gmra.mrb[28].mxu0 %v1505_v32 }
 0x30e   :  { %v1948_v54 = vpop.f32.mrb[32].mxu1 }
 0x30f   :  { %v1395_v59 = vadd.f32 %v1948_v54, %v2941_v4  ;;  %v1386_v16 = vpop.f32.mrb[33].mxu1 }
 0x310   :  { %v1387_v5 = vadd.f32 %v2941_v4, %v1386_v16  ;;  %v1949_v40 = vpop.f32.mrb[34].mxu1 }
 0x311   :  { %v1398_v52 = vadd.f32 %v1949_v40, %v2941_v4  ;;  %v1389_v18 = vpop.f32.mrb[35].mxu1  ;;  %v1467_v36 = vmax.f32 %v1395_v59, 0.0 }
 0x312   :  { %v1390_v45 = vadd.f32 %v2941_v4, %v1389_v18  ;;  %v1465_v19 = vmax.f32 %v1387_v5, 0.0 }
 0x313   :  { %v1468_v38 = vmax.f32 %v1398_v52, 0.0 }
 0x314   :  { %v1466_v11 = vmax.f32 %v1390_v45, 0.0 }
 0x315   :  { %v1507_v13 = vpack.c.bf16 %v1468_v38, %v1467_v36 }
 0x316   :  { %v1506_v47 = vpack.c.bf16 %v1466_v11, %v1465_v19 }
 0x318   :  { %1994 = vmatprep.mubr.bf16.mxu0 %v1506_v47 }
 0x319   :  { %1995 = vmatmul.mubr.bf16.gmra.mrb[32].mxu0 %v1507_v13 }
 0x33a   :  { %v1952_v43 = vpop.f32.mrb[36].mxu1 }
 0x33b   :  { %v1411_v28 = vadd.f32 %v1952_v43, %v2941_v4  ;;  %v1402_v27 = vpop.f32.mrb[37].mxu1 }
 0x33c   :  { %v1403_v49 = vadd.f32 %v2941_v4, %v1402_v27  ;;  %v1953_v30 = vpop.f32.mrb[38].mxu1 }
 0x33d   :  { %v1414_v0 = vadd.f32 %v1953_v30, %v2941_v4  ;;  %v1405_v57 = vpop.f32.mrb[39].mxu1  ;;  %v1471_v24 = vmax.f32 %v1411_v28, 0.0 }
 0x33e   :  { %v1406_v51 = vadd.f32 %v2941_v4, %v1405_v57  ;;  %v1469_v55 = vmax.f32 %v1403_v49, 0.0 }
 0x33f   :  { %v1472_v48 = vmax.f32 %v1414_v0, 0.0 }
 0x340   :  { %v1470_v60 = vmax.f32 %v1406_v51, 0.0 }
 0x341   :  { %v1509_v12 = vpack.c.bf16 %v1472_v48, %v1471_v24 }
 0x342   :  { %v1508_v61 = vpack.c.bf16 %v1470_v60, %v1469_v55 }
 0x344   :  { %1998 = vmatprep.mubr.bf16.mxu0 %v1508_v61 }
 0x345   :  { %1999 = vmatmul.mubr.bf16.gmra.mrb[36].mxu0 %v1509_v12 }
 0x366   :  { %v1956_v62 = vpop.f32.mrb[40].mxu1 }
 0x367   :  { %v1427_v31 = vadd.f32 %v1956_v62, %v2941_v4  ;;  %v1418_v46 = vpop.f32.mrb[41].mxu1 }
 0x368   :  { %v1419_v50 = vadd.f32 %v2941_v4, %v1418_v46  ;;  %v1957_v20 = vpop.f32.mrb[42].mxu1 }
 0x369   :  { %v1430_v34 = vadd.f32 %v1957_v20, %v2941_v4  ;;  %v1421_v37 = vpop.f32.mrb[43].mxu1  ;;  %v1475_v44 = vmax.f32 %v1427_v31, 0.0 }
 0x36a   :  { %v1422_v56 = vadd.f32 %v2941_v4, %v1421_v37  ;;  %v1473_v63 = vmax.f32 %v1419_v50, 0.0 }
 0x36b   :  { %v1476_v53 = vmax.f32 %v1430_v34, 0.0 }
 0x36c   :  { %v1474_v15 = vmax.f32 %v1422_v56, 0.0 }
 0x36d   :  { %v1511_v33 = vpack.c.bf16 %v1476_v53, %v1475_v44 }
 0x36e   :  { %v1510_v41 = vpack.c.bf16 %v1474_v15, %v1473_v63 }
 0x370   :  { %2002 = vmatprep.mubr.bf16.mxu0 %v1510_v41 }
 0x371   :  { %2003 = vmatmul.mubr.bf16.gmra.mrb[40].mxu0 %v1511_v33 }
 0x392   :  { %v1960_v6 = vpop.f32.mrb[44].mxu1 }
 0x393   :  { %v1443_v26 = vadd.f32 %v1960_v6, %v2941_v4  ;;  %v1434_v23 = vpop.f32.mrb[45].mxu1 }
 0x394   :  { %v1435_v10 = vadd.f32 %v2941_v4, %v1434_v23  ;;  %v1961_v35 = vpop.f32.mrb[46].mxu1 }
 0x395   :  { %v1446_v14 = vadd.f32 %v1961_v35, %v2941_v4  ;;  %v1437_v22 = vpop.f32.mrb[47].mxu1  ;;  %v1479_v8 = vmax.f32 %v1443_v26, 0.0 }
 0x396   :  { %v1438_v1 = vadd.f32 %v2941_v4, %v1437_v22  ;;  %v1477_v21 = vmax.f32 %v1435_v10, 0.0 }
 0x397   :  { %v1480_v7 = vmax.f32 %v1446_v14, 0.0 }
 0x398   :  { %v1478_v2 = vmax.f32 %v1438_v1, 0.0 }
 0x399   :  { %v1513_v25 = vpack.c.bf16 %v1480_v7, %v1479_v8 }
 0x39a   :  { %v1512_v3 = vpack.c.bf16 %v1478_v2, %v1477_v21 }
 0x39c   :  { %2006 = vmatprep.mubr.bf16.mxu0 %v1512_v3 }
 0x39d   :  { %2007 = vmatmul.mubr.bf16.gmra.mrb[44].mxu0 %v1513_v25 }
 0x3a4   :  { %v1980_v29 = vpop.f32.mrb[16].mxu0 }
 0x3a5   :  { %v1611_v58 = vadd.f32 %v1980_v29, %v2978_v39  ;;  %v1602_v42 = vpop.f32.mrb[17].mxu0 }
 0x3a6   :  { %v1603_v4 = vadd.f32 %v2978_v39, %v1602_v42  ;;  %v1981_v9 = vpop.f32.mrb[18].mxu0 }
 0x3a7   :  { %1732 = vst.msk [vmem:[%s3149_s9 + $0x10] sm:$0xff] %vm1729_vm0, %v1611_v58  ;;  %v1614_v32 = vadd.f32 %v1981_v9, %v2978_v39  ;;  %v1605_v17 = vpop.f32.mrb[19].mxu0 }
 0x3a8   :  { %1730 = vst.msk [vmem:[%s3149_s9] sm:$0xff] %vm1729_vm0, %v1603_v4  ;;  %v1606_v54 = vadd.f32 %v2978_v39, %v1605_v17 }
 0x3a9   :  { %1733 = vst.msk [vmem:[%s3149_s9 + $0x18] sm:$0xff] %vm1729_vm0, %v1614_v32 }
 0x3aa   :  { %1731 = vst.msk [vmem:[%s3149_s9 + $0x8] sm:$0xff] %vm1729_vm0, %v1606_v54 }
 0x3ac   :  { %v1984_v59 = vpop.f32.mrb[20].mxu0 }
 0x3ad   :  { %v1627_v16 = vadd.f32 %v1984_v59, %v2978_v39  ;;  %v1618_v5 = vpop.f32.mrb[21].mxu0 }
 0x3ae   :  { %v1619_v40 = vadd.f32 %v2978_v39, %v1618_v5  ;;  %v1985_v52 = vpop.f32.mrb[22].mxu0 }
 0x3af   :  { %1736 = vst.msk [vmem:[%s3149_s9 + $0x30] sm:$0xff] %vm1729_vm0, %v1627_v16  ;;  %v1630_v18 = vadd.f32 %v1985_v52, %v2978_v39  ;;  %v1621_v45 = vpop.f32.mrb[23].mxu0 }
 0x3b0   :  { %1734 = vst.msk [vmem:[%s3149_s9 + $0x20] sm:$0xff] %vm1729_vm0, %v1619_v40  ;;  %v1622_v36 = vadd.f32 %v2978_v39, %v1621_v45 }
 0x3b1   :  { %1737 = vst.msk [vmem:[%s3149_s9 + $0x38] sm:$0xff] %vm1729_vm0, %v1630_v18 }
 0x3b2   :  { %1735 = vst.msk [vmem:[%s3149_s9 + $0x28] sm:$0xff] %vm1729_vm0, %v1622_v36 }
 0x3b4   :  { %v1988_v38 = vpop.f32.mrb[24].mxu0 }
 0x3b5   :  { %v1643_v19 = vadd.f32 %v1988_v38, %v2978_v39  ;;  %v1634_v11 = vpop.f32.mrb[25].mxu0 }
 0x3b6   :  { %v1635_v13 = vadd.f32 %v2978_v39, %v1634_v11  ;;  %v1989_v47 = vpop.f32.mrb[26].mxu0 }
 0x3b7   :  { %1740 = vst.msk [vmem:[%s3149_s9 + $0x50] sm:$0xff] %vm1729_vm0, %v1643_v19  ;;  %v1646_v43 = vadd.f32 %v1989_v47, %v2978_v39  ;;  %v1637_v28 = vpop.f32.mrb[27].mxu0 }
 0x3b8   :  { %1738 = vst.msk [vmem:[%s3149_s9 + $0x40] sm:$0xff] %vm1729_vm0, %v1635_v13  ;;  %v1638_v27 = vadd.f32 %v2978_v39, %v1637_v28 }
 0x3b9   :  { %1741 = vst.msk [vmem:[%s3149_s9 + $0x58] sm:$0xff] %vm1729_vm0, %v1646_v43 }
 0x3ba   :  { %1739 = vst.msk [vmem:[%s3149_s9 + $0x48] sm:$0xff] %vm1729_vm0, %v1638_v27 }
 0x3c0   :  { %v1992_v49 = vpop.f32.mrb[28].mxu0 }
 0x3c1   :  { %v1659_v30 = vadd.f32 %v1992_v49, %v2978_v39  ;;  %v1650_v0 = vpop.f32.mrb[29].mxu0 }
 0x3c2   :  { %v1651_v57 = vadd.f32 %v2978_v39, %v1650_v0  ;;  %v1993_v51 = vpop.f32.mrb[30].mxu0 }
 0x3c3   :  { %1744 = vst.msk [vmem:[%s3149_s9 + $0x70] sm:$0xff] %vm1729_vm0, %v1659_v30  ;;  %v1662_v24 = vadd.f32 %v1993_v51, %v2978_v39  ;;  %v1653_v48 = vpop.f32.mrb[31].mxu0 }
 0x3c4   :  { %1742 = vst.msk [vmem:[%s3149_s9 + $0x60] sm:$0xff] %vm1729_vm0, %v1651_v57  ;;  %v1654_v55 = vadd.f32 %v2978_v39, %v1653_v48 }
 0x3c5   :  { %1745 = vst.msk [vmem:[%s3149_s9 + $0x78] sm:$0xff] %vm1729_vm0, %v1662_v24 }
 0x3c6   :  { %1743 = vst.msk [vmem:[%s3149_s9 + $0x68] sm:$0xff] %vm1729_vm0, %v1654_v55 }
 0x3ec   :  { %v1996_v60 = vpop.f32.mrb[32].mxu0 }
 0x3ed   :  { %v1675_v12 = vadd.f32 %v1996_v60, %v2978_v39  ;;  %v1666_v61 = vpop.f32.mrb[33].mxu0 }
 0x3ee   :  { %v1667_v62 = vadd.f32 %v2978_v39, %v1666_v61  ;;  %v1997_v31 = vpop.f32.mrb[34].mxu0 }
 0x3ef   :  { %1748 = vst.msk [vmem:[%s3149_s9 + $0x90] sm:$0xff] %vm1729_vm0, %v1675_v12  ;;  %v1678_v46 = vadd.f32 %v1997_v31, %v2978_v39  ;;  %v1669_v50 = vpop.f32.mrb[35].mxu0 }
 0x3f0   :  { %1746 = vst.msk [vmem:[%s3149_s9 + $0x80] sm:$0xff] %vm1729_vm0, %v1667_v62  ;;  %v1670_v20 = vadd.f32 %v2978_v39, %v1669_v50 }
 0x3f1   :  { %1749 = vst.msk [vmem:[%s3149_s9 + $0x98] sm:$0xff] %vm1729_vm0, %v1678_v46 }
 0x3f2   :  { %1747 = vst.msk [vmem:[%s3149_s9 + $0x88] sm:$0xff] %vm1729_vm0, %v1670_v20 }
 0x418   :  { %v2000_v34 = vpop.f32.mrb[36].mxu0 }
 0x419   :  { %v1691_v37 = vadd.f32 %v2000_v34, %v2978_v39  ;;  %v1682_v56 = vpop.f32.mrb[37].mxu0 }
 0x41a   :  { %v1683_v44 = vadd.f32 %v2978_v39, %v1682_v56  ;;  %v2001_v53 = vpop.f32.mrb[38].mxu0 }
 0x41b   :  { %1752 = vst.msk [vmem:[%s3149_s9 + $0xb0] sm:$0xff] %vm1729_vm0, %v1691_v37  ;;  %v1694_v63 = vadd.f32 %v2001_v53, %v2978_v39  ;;  %v1685_v15 = vpop.f32.mrb[39].mxu0 }
 0x41c   :  { %1750 = vst.msk [vmem:[%s3149_s9 + $0xa0] sm:$0xff] %vm1729_vm0, %v1683_v44  ;;  %v1686_v33 = vadd.f32 %v2978_v39, %v1685_v15 }
 0x41d   :  { %1753 = vst.msk [vmem:[%s3149_s9 + $0xb8] sm:$0xff] %vm1729_vm0, %v1694_v63 }
 0x41e   :  { %1751 = vst.msk [vmem:[%s3149_s9 + $0xa8] sm:$0xff] %vm1729_vm0, %v1686_v33 }
 0x444   :  { %v2004_v41 = vpop.f32.mrb[40].mxu0 }
 0x445   :  { %v1707_v6 = vadd.f32 %v2004_v41, %v2978_v39  ;;  %v1698_v26 = vpop.f32.mrb[41].mxu0 }
 0x446   :  { %v1699_v23 = vadd.f32 %v2978_v39, %v1698_v26  ;;  %v2005_v10 = vpop.f32.mrb[42].mxu0 }
 0x447   :  { %1756 = vst.msk [vmem:[%s3149_s9 + $0xd0] sm:$0xff] %vm1729_vm0, %v1707_v6  ;;  %v1710_v35 = vadd.f32 %v2005_v10, %v2978_v39  ;;  %v1701_v14 = vpop.f32.mrb[43].mxu0 }
 0x448   :  { %1754 = vst.msk [vmem:[%s3149_s9 + $0xc0] sm:$0xff] %vm1729_vm0, %v1699_v23  ;;  %v1702_v22 = vadd.f32 %v2978_v39, %v1701_v14 }
 0x449   :  { %1757 = vst.msk [vmem:[%s3149_s9 + $0xd8] sm:$0xff] %vm1729_vm0, %v1710_v35 }
 0x44a   :  { %1755 = vst.msk [vmem:[%s3149_s9 + $0xc8] sm:$0xff] %vm1729_vm0, %v1702_v22 }
 0x470   :  { %v2008_v1 = vpop.f32.mrb[44].mxu0 }
 0x471   :  { %v1723_v8 = vadd.f32 %v2008_v1, %v2978_v39  ;;  %v1714_v7 = vpop.f32.mrb[45].mxu0 }
 0x472   :  { %v1715_v21 = vadd.f32 %v2978_v39, %v1714_v7  ;;  %v2009_v2 = vpop.f32.mrb[46].mxu0 }
 0x473   :  { %1760 = vst.msk [vmem:[%s3149_s9 + $0xf0] sm:$0xff] %vm1729_vm0, %v1723_v8  ;;  %v1726_v25 = vadd.f32 %v2009_v2, %v2978_v39  ;;  %v1717_v3 = vpop.f32.mrb[47].mxu0 }
 0x474   :  { %1758 = vst.msk [vmem:[%s3149_s9 + $0xe0] sm:$0xff] %vm1729_vm0, %v1715_v21  ;;  %v1718_v29 = vadd.f32 %v2978_v39, %v1717_v3 }
 0x475   :  { %1761 = vst.msk [vmem:[%s3149_s9 + $0xf8] sm:$0xff] %vm1729_vm0, %v1726_v25 }
 0x476   :  { %1759 = vst.msk [vmem:[%s3149_s9 + $0xe8] sm:$0xff] %vm1729_vm0, %v1718_v29 }

</bundles_post_ra>
